<compile_context>
chip_gen: v7x
topology: tpu7x:2x2x1
jax: 0.10.0
libtpu: 0.0.40
codegen_flags: <defaults>
</compile_context>

<pallas_src>
import math
from functools import partial

import jax
import jax.numpy as jnp
from jax.experimental import pallas as pl
from jax.experimental.pallas import tpu as pltpu


# ----------------------------- Pallas kernels -----------------------------

def _embed_kernel(tok_ref, w_ref, b_ref, o_ref):
    # DataEmbedding_inverted for one batch element: tokens [T, L] @ W [L, D] + b
    o_ref[...] = jnp.dot(tok_ref[...], w_ref[...],
                         preferred_element_type=jnp.float32) + b_ref[...]


def _encoder_layer_kernel(x_ref, wqkv_ref, bqkv_ref, wo_ref, bo_ref,
                          ln1g_ref, ln1b_ref, w1_ref, b1_ref,
                          w2_ref, b2_ref, ln2g_ref, ln2b_ref,
                          o_ref, *, n_heads):
    """One full iTransformer encoder layer for one batch element, all in VMEM.

    x_ref:    [T, D]
    wqkv_ref: [3*H, D, E]  (q heads, then k heads, then v heads)
    bqkv_ref: [3*H, 1, E]
    wo_ref:   [H, E, D]    (out-projection rows per head)
    """
    x = x_ref[...]                               # [T, D]
    T, D = x.shape
    E = D // n_heads
    scale = 1.0 / math.sqrt(E)

    # --- multi-head self attention (head loop unrolled; all plain 2-D dots) ---
    attn = jnp.zeros((T, D), jnp.float32)
    for h in range(n_heads):
        q = jnp.dot(x, wqkv_ref[h],
                    preferred_element_type=jnp.float32) + bqkv_ref[h]
        k = jnp.dot(x, wqkv_ref[n_heads + h],
                    preferred_element_type=jnp.float32) + bqkv_ref[n_heads + h]
        v = jnp.dot(x, wqkv_ref[2 * n_heads + h],
                    preferred_element_type=jnp.float32) + bqkv_ref[2 * n_heads + h]
        s = jax.lax.dot_general(q, k, (((1,), (1,)), ((), ())),
                                preferred_element_type=jnp.float32) * scale
        s = s - jnp.max(s, axis=-1, keepdims=True)
        p = jnp.exp(s)
        p = p / jnp.sum(p, axis=-1, keepdims=True)
        o_h = jnp.dot(p, v, preferred_element_type=jnp.float32)     # [T, E]
        # concat(heads) @ Wo == sum_h head_h @ Wo[h]
        attn = attn + jnp.dot(o_h, wo_ref[h],
                              preferred_element_type=jnp.float32)
    attn = attn + bo_ref[...]

    # --- residual + LayerNorm1 ---
    res = x + attn
    mu = jnp.mean(res, axis=-1, keepdims=True)
    xc = res - mu
    var = jnp.mean(xc * xc, axis=-1, keepdims=True)
    x1 = xc * jax.lax.rsqrt(var + 1e-5) * ln1g_ref[...] + ln1b_ref[...]

    # --- FFN (conv1/conv2 with kernel_size=1 == two linears), ReLU ---
    h1 = jnp.dot(x1, w1_ref[...], preferred_element_type=jnp.float32) + b1_ref[...]
    h1 = jnp.maximum(h1, 0.0)
    y = jnp.dot(h1, w2_ref[...], preferred_element_type=jnp.float32) + b2_ref[...]

    # --- residual + LayerNorm2 ---
    res2 = x1 + y
    mu2 = jnp.mean(res2, axis=-1, keepdims=True)
    xc2 = res2 - mu2
    var2 = jnp.mean(xc2 * xc2, axis=-1, keepdims=True)
    o_ref[...] = xc2 * jax.lax.rsqrt(var2 + 1e-5) * ln2g_ref[...] + ln2b_ref[...]


def _head_kernel(x_ref, g_ref, b_ref, w_ref, pb_ref, mu_ref, std_ref, o_ref):
    """Final encoder LayerNorm + projection (D -> pred_len) + de-normalization
    for one batch element.  Output: [N, pred_len] already scaled/shifted back.
    """
    x = x_ref[...]                               # [T, D]
    n_var = o_ref.shape[0]
    mu = jnp.mean(x, axis=-1, keepdims=True)
    xc = x - mu
    var = jnp.mean(xc * xc, axis=-1, keepdims=True)
    xn = xc * jax.lax.rsqrt(var + 1e-5) * g_ref[...] + b_ref[...]
    dec = jnp.dot(xn, w_ref[...], preferred_element_type=jnp.float32) + pb_ref[...]
    # keep only the N variate tokens (drop time-mark tokens), de-normalize
    o_ref[...] = dec[:n_var, :] * std_ref[...] + mu_ref[...]


# ----------------------------- wrappers -----------------------------

def _fixed_spec(shape):
    # whole-array block, same for every grid step
    return pl.BlockSpec(shape, lambda b: (0,) * len(shape))


def pallas_embedding(tokens, emb_w, emb_b):
    # tokens: [B, T, L]
    B, T, L = tokens.shape
    D = emb_w.shape[1]
    return pl.pallas_call(
        _embed_kernel,
        grid=(B,),
        in_specs=[
            pl.BlockSpec((None, T, L), lambda b: (b, 0, 0)),
            _fixed_spec((L, D)),
            _fixed_spec((1, D)),
        ],
        out_specs=pl.BlockSpec((None, T, D), lambda b: (b, 0, 0)),
        out_shape=jax.ShapeDtypeStruct((B, T, D), jnp.float32),
        compiler_params=pltpu.CompilerParams(
            dimension_semantics=("parallel",)),
    )(tokens, emb_w, emb_b)


def pallas_encoder_layer(x, p, n_heads):
    B, T, D = x.shape
    E = D // n_heads
    F = p["w1"].shape[1]
    return pl.pallas_call(
        partial(_encoder_layer_kernel, n_heads=n_heads),
        grid=(B,),
        in_specs=[
            pl.BlockSpec((None, T, D), lambda b: (b, 0, 0)),
            _fixed_spec((3 * n_heads, D, E)),   # wqkv
            _fixed_spec((3 * n_heads, 1, E)),   # bqkv
            _fixed_spec((n_heads, E, D)),       # wo
            _fixed_spec((1, D)),                # bo
            _fixed_spec((1, D)), _fixed_spec((1, D)),   # ln1 gamma/beta
            _fixed_spec((D, F)), _fixed_spec((1, F)),   # w1/b1
            _fixed_spec((F, D)), _fixed_spec((1, D)),   # w2/b2
            _fixed_spec((1, D)), _fixed_spec((1, D)),   # ln2 gamma/beta
        ],
        out_specs=pl.BlockSpec((None, T, D), lambda b: (b, 0, 0)),
        out_shape=jax.ShapeDtypeStruct((B, T, D), jnp.float32),
        compiler_params=pltpu.CompilerParams(
            dimension_semantics=("parallel",)),
    )(x, p["wqkv"], p["bqkv"], p["wo"], p["bo"],
      p["ln1_g"], p["ln1_b"], p["w1"], p["b1"],
      p["w2"], p["b2"], p["ln2_g"], p["ln2_b"])


def pallas_head(enc, norm_g, norm_b, proj_w, proj_b, mu_t, std_t):
    # enc: [B, T, D], mu_t/std_t: [B, N, 1] -> output [B, N, pred_len]
    B, T, D = enc.shape
    P = proj_w.shape[1]
    N = mu_t.shape[1]
    return pl.pallas_call(
        _head_kernel,
        grid=(B,),
        in_specs=[
            pl.BlockSpec((None, T, D), lambda b: (b, 0, 0)),
            _fixed_spec((1, D)), _fixed_spec((1, D)),
            _fixed_spec((D, P)), _fixed_spec((1, P)),
            pl.BlockSpec((None, N, 1), lambda b: (b, 0, 0)),
            pl.BlockSpec((None, N, 1), lambda b: (b, 0, 0)),
        ],
        out_specs=pl.BlockSpec((None, N, P), lambda b: (b, 0, 0)),
        out_shape=jax.ShapeDtypeStruct((B, N, P), jnp.float32),
        compiler_params=pltpu.CompilerParams(
            dimension_semantics=("parallel",)),
    )(enc, norm_g, norm_b, proj_w, proj_b, mu_t, std_t)


# ----------------------------- model glue -----------------------------

@partial(jax.jit, static_argnums=(3, 4))
def itransformer_forecast(x_enc, x_mark_enc, params, n_heads, pred_len):
    B, L, N = x_enc.shape

    # Non-stationary normalization (RevIN) -- plain XLA, fuses into a few tiny ops.
    mean = jnp.mean(x_enc, axis=1, keepdims=True)                 # [B, 1, N]
    xc = x_enc - mean
    var = jnp.mean(xc * xc, axis=1, keepdims=True)
    std = jnp.sqrt(var + 1e-5)                                    # [B, 1, N]
    xn = xc / std

    # Inverted tokens [B, T, L]; transpose+concat is a few hundred bytes, fused by XLA.
    tokens = jnp.concatenate(
        [jnp.swapaxes(xn, 1, 2), jnp.swapaxes(x_mark_enc, 1, 2)], axis=1)

    enc = pallas_embedding(tokens, params["emb_w"], params["emb_b"])  # [B, T, D]

    for lp in params["layers"]:
        enc = pallas_encoder_layer(enc, lp, n_heads)

    mu_t = jnp.transpose(mean, (0, 2, 1))                         # [B, N, 1]
    std_t = jnp.transpose(std, (0, 2, 1))                         # [B, N, 1]
    dec = pallas_head(enc, params["norm_g"], params["norm_b"],
                      params["proj_w"], params["proj_b"], mu_t, std_t)  # [B, N, P]

    dec = jnp.transpose(dec, (0, 2, 1))                           # [B, pred_len, N]
    return dec[:, -pred_len:, :]


def init_params(key, seq_len, d_model, n_heads, d_ff, pred_len, e_layers):
    E = d_model // n_heads

    def normal(k, shape, fan_in):
        return jax.random.normal(k, shape, jnp.float32) * (1.0 / math.sqrt(fan_in))

    keys = jax.random.split(key, 2 + e_layers)
    params = {
        "emb_w": normal(keys[0], (seq_len, d_model), seq_len),
        "emb_b": jnp.zeros((1, d_model), jnp.float32),
        "proj_w": normal(keys[1], (d_model, pred_len), d_model),
        "proj_b": jnp.zeros((1, pred_len), jnp.float32),
        "norm_g": jnp.ones((1, d_model), jnp.float32),
        "norm_b": jnp.zeros((1, d_model), jnp.float32),
        "layers": [],
    }
    for i in range(e_layers):
        lks = jax.random.split(keys[2 + i], 4)
        lp = {
            # Q|K|V projection weights stacked head-major: [3*H, d_model, E]
            "wqkv": normal(lks[0], (3 * n_heads, d_model, E), d_model),
            "bqkv": jnp.zeros((3 * n_heads, 1, E), jnp.float32),
            # output projection, head-major rows: [H, E, d_model]
            "wo": normal(lks[1], (n_heads, E, d_model), d_model),
            "bo": jnp.zeros((1, d_model), jnp.float32),
            "w1": normal(lks[2], (d_model, d_ff), d_model),
            "b1": jnp.zeros((1, d_ff), jnp.float32),
            "w2": normal(lks[3], (d_ff, d_model), d_ff),
            "b2": jnp.zeros((1, d_model), jnp.float32),
            "ln1_g": jnp.ones((1, d_model), jnp.float32),
            "ln1_b": jnp.zeros((1, d_model), jnp.float32),
            "ln2_g": jnp.ones((1, d_model), jnp.float32),
            "ln2_b": jnp.zeros((1, d_model), jnp.float32),
        }
        params["layers"].append(lp)
    return params


if __name__ == "__main__":
    B, L, N, M = 2, 16, 4, 2              # batch, seq_len, enc_in, time-mark channels
    d_model, n_heads, d_ff, e_layers, pred_len = 32, 4, 64, 2, 8

    key = jax.random.PRNGKey(0)
    k1, k2, k3 = jax.random.split(key, 3)
    x_enc = jax.random.normal(k1, (B, L, N), jnp.float32)
    x_mark_enc = jax.random.normal(k2, (B, L, M), jnp.float32)
    params = init_params(k3, L, d_model, n_heads, d_ff, pred_len, e_layers)

    out = itransformer_forecast(x_enc, x_mark_enc, params, n_heads, pred_len)
    out = jax.block_until_ready(out)
    assert out.shape == (B, pred_len, N), out.shape
    assert bool(jnp.all(jnp.isfinite(out)))
    print("KERNEL_OK")
</pallas_src>

<mosaic_0001>
module attributes {stable_mosaic.version = 11 : i64} {
  func.func @_embed_kernel(%arg0: i32, %arg1: memref<1x6x16xf32, #tpu.memory_space<vmem>>, %arg2: memref<16x32xf32, #tpu.memory_space<vmem>>, %arg3: memref<1x32xf32, #tpu.memory_space<vmem>>, %arg4: memref<1x6x32xf32, #tpu.memory_space<vmem>>) attributes {dimension_semantics = [#tpu.dimension_semantics<parallel>], iteration_bounds = array<i64: 2>, scalar_prefetch = 0 : i64, scratch_operands = 0 : i64, tpu.core_type = #tpu.core_type<tc>, window_params = [{transform_indices = @transform_0, window_bounds = array<i64: 1, 6, 16>}, {pipeline_mode = #tpu.pipeline_mode<synchronous>, transform_indices = @transform_1, window_bounds = array<i64: 16, 32>}, {pipeline_mode = #tpu.pipeline_mode<synchronous>, transform_indices = @transform_2, window_bounds = array<i64: 1, 32>}, {transform_indices = @transform_3, window_bounds = array<i64: 1, 6, 32>}]} {
    %c0 = arith.constant 0 : index
    %c0_0 = arith.constant 0 : index
    %c0_1 = arith.constant 0 : index
    %0 = vector.load %arg1[%c0, %c0_0, %c0_1] : memref<1x6x16xf32, #tpu.memory_space<vmem>>, vector<1x6x16xf32>
    %1 = vector.shape_cast %0 : vector<1x6x16xf32> to vector<6x16xf32>
    %c0_2 = arith.constant 0 : index
    %c0_3 = arith.constant 0 : index
    %2 = vector.load %arg2[%c0_2, %c0_3] : memref<16x32xf32, #tpu.memory_space<vmem>>, vector<16x32xf32>
    %cst = arith.constant dense<0.000000e+00> : vector<6x32xf32>
    %3 = tpu.matmul %1, %2, %cst {dimension_numbers = #tpu.dot_dimension_numbers<[1], [0], [0], [1], [0, 0, 1, 1], [], []>} : vector<6x16xf32>, vector<16x32xf32>, vector<6x32xf32> -> vector<6x32xf32>
    %c0_4 = arith.constant 0 : index
    %c0_5 = arith.constant 0 : index
    %4 = vector.load %arg3[%c0_4, %c0_5] : memref<1x32xf32, #tpu.memory_space<vmem>>, vector<1x32xf32>
    %5 = vector.broadcast %4 : vector<1x32xf32> to vector<6x32xf32>
    %6 = arith.addf %3, %5 : vector<6x32xf32>
    %c0_6 = arith.constant 0 : index
    %c0_7 = arith.constant 0 : index
    %c0_8 = arith.constant 0 : index
    %7 = vector.load %arg4[%c0_6, %c0_7, %c0_8] : memref<1x6x32xf32, #tpu.memory_space<vmem>>, vector<1x6x32xf32>
    %8 = vector.shape_cast %7 : vector<1x6x32xf32> to vector<6x32xf32>
    %9 = vector.shape_cast %6 : vector<6x32xf32> to vector<1x6x32xf32>
    tpu.vector_store %arg4[%c0_6, %c0_7, %c0_8], %9 {strides = array<i32>} : memref<1x6x32xf32, #tpu.memory_space<vmem>>, vector<1x6x32xf32>,
    return
  }
  func.func @transform_0(%arg0: i32) -> (i32, i32, i32) {
    %c0_i32 = arith.constant 0 : i32
    %c0_i32_0 = arith.constant 0 : i32
    %c0_i32_1 = arith.constant 0 : i32
    return %arg0, %c0_i32, %c0_i32_0 : i32, i32, i32
  }
  func.func @transform_1(%arg0: i32) -> (i32, i32) {
    %c0_i32 = arith.constant 0 : i32
    %c0_i32_0 = arith.constant 0 : i32
    %c0_i32_1 = arith.constant 0 : i32
    return %c0_i32, %c0_i32_0 : i32, i32
  }
  func.func @transform_2(%arg0: i32) -> (i32, i32) {
    %c0_i32 = arith.constant 0 : i32
    %c0_i32_0 = arith.constant 0 : i32
    %c0_i32_1 = arith.constant 0 : i32
    return %c0_i32, %c0_i32_0 : i32, i32
  }
  func.func @transform_3(%arg0: i32) -> (i32, i32, i32) {
    %c0_i32 = arith.constant 0 : i32
    %c0_i32_0 = arith.constant 0 : i32
    %c0_i32_1 = arith.constant 0 : i32
    return %arg0, %c0_i32, %c0_i32_0 : i32, i32, i32
  }
}

module attributes {stable_mosaic.version = 11 : i64} {
  func.func @_encoder_layer_kernel(%arg0: i32, %arg1: memref<1x6x32xf32, #tpu.memory_space<vmem>>, %arg2: memref<12x32x8xf32, #tpu.memory_space<vmem>>, %arg3: memref<12x1x8xf32, #tpu.memory_space<vmem>>, %arg4: memref<4x8x32xf32, #tpu.memory_space<vmem>>, %arg5: memref<1x32xf32, #tpu.memory_space<vmem>>, %arg6: memref<1x32xf32, #tpu.memory_space<vmem>>, %arg7: memref<1x32xf32, #tpu.memory_space<vmem>>, %arg8: memref<32x64xf32, #tpu.memory_space<vmem>>, %arg9: memref<1x64xf32, #tpu.memory_space<vmem>>, %arg10: memref<64x32xf32, #tpu.memory_space<vmem>>, %arg11: memref<1x32xf32, #tpu.memory_space<vmem>>, %arg12: memref<1x32xf32, #tpu.memory_space<vmem>>, %arg13: memref<1x32xf32, #tpu.memory_space<vmem>>, %arg14: memref<1x6x32xf32, #tpu.memory_space<vmem>>) attributes {dimension_semantics = [#tpu.dimension_semantics<parallel>], iteration_bounds = array<i64: 2>, scalar_prefetch = 0 : i64, scratch_operands = 0 : i64, tpu.core_type = #tpu.core_type<tc>, window_params = [{transform_indices = @transform_0, window_bounds = array<i64: 1, 6, 32>}, {pipeline_mode = #tpu.pipeline_mode<synchronous>, transform_indices = @transform_1, window_bounds = array<i64: 12, 32, 8>}, {pipeline_mode = #tpu.pipeline_mode<synchronous>, transform_indices = @transform_2, window_bounds = array<i64: 12, 1, 8>}, {pipeline_mode = #tpu.pipeline_mode<synchronous>, transform_indices = @transform_3, window_bounds = array<i64: 4, 8, 32>}, {pipeline_mode = #tpu.pipeline_mode<synchronous>, transform_indices = @transform_4, window_bounds = array<i64: 1, 32>}, {pipeline_mode = #tpu.pipeline_mode<synchronous>, transform_indices = @transform_5, window_bounds = array<i64: 1, 32>}, {pipeline_mode = #tpu.pipeline_mode<synchronous>, transform_indices = @transform_6, window_bounds = array<i64: 1, 32>}, {pipeline_mode = #tpu.pipeline_mode<synchronous>, transform_indices = @transform_7, window_bounds = array<i64: 32, 64>}, {pipeline_mode = #tpu.pipeline_mode<synchronous>, transform_indices = @transform_8, window_bounds = array<i64: 1, 64>}, {pipeline_mode = #tpu.pipeline_mode<synchronous>, transform_indices = @transform_9, window_bounds = array<i64: 64, 32>}, {pipeline_mode = #tpu.pipeline_mode<synchronous>, transform_indices = @transform_10, window_bounds = array<i64: 1, 32>}, {pipeline_mode = #tpu.pipeline_mode<synchronous>, transform_indices = @transform_11, window_bounds = array<i64: 1, 32>}, {pipeline_mode = #tpu.pipeline_mode<synchronous>, transform_indices = @transform_12, window_bounds = array<i64: 1, 32>}, {transform_indices = @transform_13, window_bounds = array<i64: 1, 6, 32>}]} {
    %c0 = arith.constant 0 : index
    %c0_0 = arith.constant 0 : index
    %c0_1 = arith.constant 0 : index
    %0 = vector.load %arg1[%c0, %c0_0, %c0_1] : memref<1x6x32xf32, #tpu.memory_space<vmem>>, vector<1x6x32xf32>
    %1 = vector.shape_cast %0 : vector<1x6x32xf32> to vector<6x32xf32>
    %cst = arith.constant 0.000000e+00 : f32
    %2 = vector.broadcast %cst : f32 to vector<6x32xf32>
    %c0_2 = arith.constant 0 : index
    %c0_3 = arith.constant 0 : index
    %c0_4 = arith.constant 0 : index
    %3 = vector.load %arg2[%c0_2, %c0_3, %c0_4] : memref<12x32x8xf32, #tpu.memory_space<vmem>>, vector<1x32x8xf32>
    %4 = vector.shape_cast %3 : vector<1x32x8xf32> to vector<32x8xf32>
    %cst_5 = arith.constant dense<0.000000e+00> : vector<6x8xf32>
    %5 = tpu.matmul %1, %4, %cst_5 {dimension_numbers = #tpu.dot_dimension_numbers<[1], [0], [0], [1], [0, 0, 1, 1], [], []>} : vector<6x32xf32>, vector<32x8xf32>, vector<6x8xf32> -> vector<6x8xf32>
    %c0_6 = arith.constant 0 : index
    %c0_7 = arith.constant 0 : index
    %c0_8 = arith.constant 0 : index
    %6 = vector.load %arg3[%c0_6, %c0_7, %c0_8] : memref<12x1x8xf32, #tpu.memory_space<vmem>>, vector<1x1x8xf32>
    %7 = vector.shape_cast %6 : vector<1x1x8xf32> to vector<1x8xf32>
    %8 = vector.broadcast %7 : vector<1x8xf32> to vector<6x8xf32>
    %9 = arith.addf %5, %8 : vector<6x8xf32>
    %c4 = arith.constant 4 : index
    %c0_9 = arith.constant 0 : index
    %c0_10 = arith.constant 0 : index
    %10 = vector.load %arg2[%c4, %c0_9, %c0_10] : memref<12x32x8xf32, #tpu.memory_space<vmem>>, vector<1x32x8xf32>
    %11 = vector.shape_cast %10 : vector<1x32x8xf32> to vector<32x8xf32>
    %cst_11 = arith.constant dense<0.000000e+00> : vector<6x8xf32>
    %12 = tpu.matmul %1, %11, %cst_11 {dimension_numbers = #tpu.dot_dimension_numbers<[1], [0], [0], [1], [0, 0, 1, 1], [], []>} : vector<6x32xf32>, vector<32x8xf32>, vector<6x8xf32> -> vector<6x8xf32>
    %c4_12 = arith.constant 4 : index
    %c0_13 = arith.constant 0 : index
    %c0_14 = arith.constant 0 : index
    %13 = vector.load %arg3[%c4_12, %c0_13, %c0_14] : memref<12x1x8xf32, #tpu.memory_space<vmem>>, vector<1x1x8xf32>
    %14 = vector.shape_cast %13 : vector<1x1x8xf32> to vector<1x8xf32>
    %15 = vector.broadcast %14 : vector<1x8xf32> to vector<6x8xf32>
    %16 = arith.addf %12, %15 : vector<6x8xf32>
    %c8 = arith.constant 8 : index
    %c0_15 = arith.constant 0 : index
    %c0_16 = arith.constant 0 : index
    %17 = vector.load %arg2[%c8, %c0_15, %c0_16] : memref<12x32x8xf32, #tpu.memory_space<vmem>>, vector<1x32x8xf32>
    %18 = vector.shape_cast %17 : vector<1x32x8xf32> to vector<32x8xf32>
    %cst_17 = arith.constant dense<0.000000e+00> : vector<6x8xf32>
    %19 = tpu.matmul %1, %18, %cst_17 {dimension_numbers = #tpu.dot_dimension_numbers<[1], [0], [0], [1], [0, 0, 1, 1], [], []>} : vector<6x32xf32>, vector<32x8xf32>, vector<6x8xf32> -> vector<6x8xf32>
    %c8_18 = arith.constant 8 : index
    %c0_19 = arith.constant 0 : index
    %c0_20 = arith.constant 0 : index
    %20 = vector.load %arg3[%c8_18, %c0_19, %c0_20] : memref<12x1x8xf32, #tpu.memory_space<vmem>>, vector<1x1x8xf32>
    %21 = vector.shape_cast %20 : vector<1x1x8xf32> to vector<1x8xf32>
    %22 = vector.broadcast %21 : vector<1x8xf32> to vector<6x8xf32>
    %23 = arith.addf %19, %22 : vector<6x8xf32>
    %cst_21 = arith.constant dense<0.000000e+00> : vector<6x6xf32>
    %24 = tpu.matmul %9, %16, %cst_21 {dimension_numbers = #tpu.dot_dimension_numbers<[1], [1], [0], [0], [0, 0, 1, 0], [], []>} : vector<6x8xf32>, vector<6x8xf32>, vector<6x6xf32> -> vector<6x6xf32>
    %cst_22 = arith.constant 0.353553385 : f32
    %25 = vector.broadcast %cst_22 : f32 to vector<6x6xf32>
    %26 = arith.mulf %24, %25 : vector<6x6xf32>
    %cst_23 = arith.constant dense<0xFF800000> : vector<6xf32>
    %27 = vector.multi_reduction <maximumf>, %26, %cst_23 [1] : vector<6x6xf32> to vector<6xf32>
    %28 = vector.shape_cast %27 : vector<6xf32> to vector<6x1xf32>
    %29 = vector.broadcast %28 : vector<6x1xf32> to vector<6x6xf32>
    %30 = arith.subf %26, %29 : vector<6x6xf32>
    %31 = math.exp %30 : vector<6x6xf32>
    %cst_24 = arith.constant dense<0.000000e+00> : vector<6xf32>
    %32 = vector.multi_reduction <add>, %31, %cst_24 [1] : vector<6x6xf32> to vector<6xf32>
    %33 = vector.shape_cast %32 : vector<6xf32> to vector<6x1xf32>
    %34 = vector.broadcast %33 : vector<6x1xf32> to vector<6x6xf32>
    %35 = arith.divf %31, %34 : vector<6x6xf32>
    %cst_25 = arith.constant dense<0.000000e+00> : vector<6x8xf32>
    %36 = tpu.matmul %35, %23, %cst_25 {dimension_numbers = #tpu.dot_dimension_numbers<[1], [0], [0], [1], [0, 0, 1, 1], [], []>} : vector<6x6xf32>, vector<6x8xf32>, vector<6x8xf32> -> vector<6x8xf32>
    %c0_26 = arith.constant 0 : index
    %c0_27 = arith.constant 0 : index
    %c0_28 = arith.constant 0 : index
    %37 = vector.load %arg4[%c0_26, %c0_27, %c0_28] : memref<4x8x32xf32, #tpu.memory_space<vmem>>, vector<1x8x32xf32>
    %38 = vector.shape_cast %37 : vector<1x8x32xf32> to vector<8x32xf32>
    %cst_29 = arith.constant dense<0.000000e+00> : vector<6x32xf32>
    %39 = tpu.matmul %36, %38, %cst_29 {dimension_numbers = #tpu.dot_dimension_numbers<[1], [0], [0], [1], [0, 0, 1, 1], [], []>} : vector<6x8xf32>, vector<8x32xf32>, vector<6x32xf32> -> vector<6x32xf32>
    %40 = arith.addf %2, %39 : vector<6x32xf32>
    %c1 = arith.constant 1 : index
    %c0_30 = arith.constant 0 : index
    %c0_31 = arith.constant 0 : index
    %41 = vector.load %arg2[%c1, %c0_30, %c0_31] : memref<12x32x8xf32, #tpu.memory_space<vmem>>, vector<1x32x8xf32>
    %42 = vector.shape_cast %41 : vector<1x32x8xf32> to vector<32x8xf32>
    %cst_32 = arith.constant dense<0.000000e+00> : vector<6x8xf32>
    %43 = tpu.matmul %1, %42, %cst_32 {dimension_numbers = #tpu.dot_dimension_numbers<[1], [0], [0], [1], [0, 0, 1, 1], [], []>} : vector<6x32xf32>, vector<32x8xf32>, vector<6x8xf32> -> vector<6x8xf32>
    %c1_33 = arith.constant 1 : index
    %c0_34 = arith.constant 0 : index
    %c0_35 = arith.constant 0 : index
    %44 = vector.load %arg3[%c1_33, %c0_34, %c0_35] : memref<12x1x8xf32, #tpu.memory_space<vmem>>, vector<1x1x8xf32>
    %45 = vector.shape_cast %44 : vector<1x1x8xf32> to vector<1x8xf32>
    %46 = vector.broadcast %45 : vector<1x8xf32> to vector<6x8xf32>
    %47 = arith.addf %43, %46 : vector<6x8xf32>
    %c5 = arith.constant 5 : index
    %c0_36 = arith.constant 0 : index
    %c0_37 = arith.constant 0 : index
    %48 = vector.load %arg2[%c5, %c0_36, %c0_37] : memref<12x32x8xf32, #tpu.memory_space<vmem>>, vector<1x32x8xf32>
    %49 = vector.shape_cast %48 : vector<1x32x8xf32> to vector<32x8xf32>
    %cst_38 = arith.constant dense<0.000000e+00> : vector<6x8xf32>
    %50 = tpu.matmul %1, %49, %cst_38 {dimension_numbers = #tpu.dot_dimension_numbers<[1], [0], [0], [1], [0, 0, 1, 1], [], []>} : vector<6x32xf32>, vector<32x8xf32>, vector<6x8xf32> -> vector<6x8xf32>
    %c5_39 = arith.constant 5 : index
    %c0_40 = arith.constant 0 : index
    %c0_41 = arith.constant 0 : index
    %51 = vector.load %arg3[%c5_39, %c0_40, %c0_41] : memref<12x1x8xf32, #tpu.memory_space<vmem>>, vector<1x1x8xf32>
    %52 = vector.shape_cast %51 : vector<1x1x8xf32> to vector<1x8xf32>
    %53 = vector.broadcast %52 : vector<1x8xf32> to vector<6x8xf32>
    %54 = arith.addf %50, %53 : vector<6x8xf32>
    %c9 = arith.constant 9 : index
    %c0_42 = arith.constant 0 : index
    %c0_43 = arith.constant 0 : index
    %55 = vector.load %arg2[%c9, %c0_42, %c0_43] : memref<12x32x8xf32, #tpu.memory_space<vmem>>, vector<1x32x8xf32>
    %56 = vector.shape_cast %55 : vector<1x32x8xf32> to vector<32x8xf32>
    %cst_44 = arith.constant dense<0.000000e+00> : vector<6x8xf32>
    %57 = tpu.matmul %1, %56, %cst_44 {dimension_numbers = #tpu.dot_dimension_numbers<[1], [0], [0], [1], [0, 0, 1, 1], [], []>} : vector<6x32xf32>, vector<32x8xf32>, vector<6x8xf32> -> vector<6x8xf32>
    %c9_45 = arith.constant 9 : index
    %c0_46 = arith.constant 0 : index
    %c0_47 = arith.constant 0 : index
    %58 = vector.load %arg3[%c9_45, %c0_46, %c0_47] : memref<12x1x8xf32, #tpu.memory_space<vmem>>, vector<1x1x8xf32>
    %59 = vector.shape_cast %58 : vector<1x1x8xf32> to vector<1x8xf32>
    %60 = vector.broadcast %59 : vector<1x8xf32> to vector<6x8xf32>
    %61 = arith.addf %57, %60 : vector<6x8xf32>
    %cst_48 = arith.constant dense<0.000000e+00> : vector<6x6xf32>
    %62 = tpu.matmul %47, %54, %cst_48 {dimension_numbers = #tpu.dot_dimension_numbers<[1], [1], [0], [0], [0, 0, 1, 0], [], []>} : vector<6x8xf32>, vector<6x8xf32>, vector<6x6xf32> -> vector<6x6xf32>
    %cst_49 = arith.constant 0.353553385 : f32
    %63 = vector.broadcast %cst_49 : f32 to vector<6x6xf32>
    %64 = arith.mulf %62, %63 : vector<6x6xf32>
    %cst_50 = arith.constant dense<0xFF800000> : vector<6xf32>
    %65 = vector.multi_reduction <maximumf>, %64, %cst_50 [1] : vector<6x6xf32> to vector<6xf32>
    %66 = vector.shape_cast %65 : vector<6xf32> to vector<6x1xf32>
    %67 = vector.broadcast %66 : vector<6x1xf32> to vector<6x6xf32>
    %68 = arith.subf %64, %67 : vector<6x6xf32>
    %69 = math.exp %68 : vector<6x6xf32>
    %cst_51 = arith.constant dense<0.000000e+00> : vector<6xf32>
    %70 = vector.multi_reduction <add>, %69, %cst_51 [1] : vector<6x6xf32> to vector<6xf32>
    %71 = vector.shape_cast %70 : vector<6xf32> to vector<6x1xf32>
    %72 = vector.broadcast %71 : vector<6x1xf32> to vector<6x6xf32>
    %73 = arith.divf %69, %72 : vector<6x6xf32>
    %cst_52 = arith.constant dense<0.000000e+00> : vector<6x8xf32>
    %74 = tpu.matmul %73, %61, %cst_52 {dimension_numbers = #tpu.dot_dimension_numbers<[1], [0], [0], [1], [0, 0, 1, 1], [], []>} : vector<6x6xf32>, vector<6x8xf32>, vector<6x8xf32> -> vector<6x8xf32>
    %c1_53 = arith.constant 1 : index
    %c0_54 = arith.constant 0 : index
    %c0_55 = arith.constant 0 : index
    %75 = vector.load %arg4[%c1_53, %c0_54, %c0_55] : memref<4x8x32xf32, #tpu.memory_space<vmem>>, vector<1x8x32xf32>
    %76 = vector.shape_cast %75 : vector<1x8x32xf32> to vector<8x32xf32>
    %cst_56 = arith.constant dense<0.000000e+00> : vector<6x32xf32>
    %77 = tpu.matmul %74, %76, %cst_56 {dimension_numbers = #tpu.dot_dimension_numbers<[1], [0], [0], [1], [0, 0, 1, 1], [], []>} : vector<6x8xf32>, vector<8x32xf32>, vector<6x32xf32> -> vector<6x32xf32>
    %78 = arith.addf %40, %77 : vector<6x32xf32>
    %c2 = arith.constant 2 : index
    %c0_57 = arith.constant 0 : index
    %c0_58 = arith.constant 0 : index
    %79 = vector.load %arg2[%c2, %c0_57, %c0_58] : memref<12x32x8xf32, #tpu.memory_space<vmem>>, vector<1x32x8xf32>
    %80 = vector.shape_cast %79 : vector<1x32x8xf32> to vector<32x8xf32>
    %cst_59 = arith.constant dense<0.000000e+00> : vector<6x8xf32>
    %81 = tpu.matmul %1, %80, %cst_59 {dimension_numbers = #tpu.dot_dimension_numbers<[1], [0], [0], [1], [0, 0, 1, 1], [], []>} : vector<6x32xf32>, vector<32x8xf32>, vector<6x8xf32> -> vector<6x8xf32>
    %c2_60 = arith.constant 2 : index
    %c0_61 = arith.constant 0 : index
    %c0_62 = arith.constant 0 : index
    %82 = vector.load %arg3[%c2_60, %c0_61, %c0_62] : memref<12x1x8xf32, #tpu.memory_space<vmem>>, vector<1x1x8xf32>
    %83 = vector.shape_cast %82 : vector<1x1x8xf32> to vector<1x8xf32>
    %84 = vector.broadcast %83 : vector<1x8xf32> to vector<6x8xf32>
    %85 = arith.addf %81, %84 : vector<6x8xf32>
    %c6 = arith.constant 6 : index
    %c0_63 = arith.constant 0 : index
    %c0_64 = arith.constant 0 : index
    %86 = vector.load %arg2[%c6, %c0_63, %c0_64] : memref<12x32x8xf32, #tpu.memory_space<vmem>>, vector<1x32x8xf32>
    %87 = vector.shape_cast %86 : vector<1x32x8xf32> to vector<32x8xf32>
    %cst_65 = arith.constant dense<0.000000e+00> : vector<6x8xf32>
    %88 = tpu.matmul %1, %87, %cst_65 {dimension_numbers = #tpu.dot_dimension_numbers<[1], [0], [0], [1], [0, 0, 1, 1], [], []>} : vector<6x32xf32>, vector<32x8xf32>, vector<6x8xf32> -> vector<6x8xf32>
    %c6_66 = arith.constant 6 : index
    %c0_67 = arith.constant 0 : index
    %c0_68 = arith.constant 0 : index
    %89 = vector.load %arg3[%c6_66, %c0_67, %c0_68] : memref<12x1x8xf32, #tpu.memory_space<vmem>>, vector<1x1x8xf32>
    %90 = vector.shape_cast %89 : vector<1x1x8xf32> to vector<1x8xf32>
    %91 = vector.broadcast %90 : vector<1x8xf32> to vector<6x8xf32>
    %92 = arith.addf %88, %91 : vector<6x8xf32>
    %c10 = arith.constant 10 : index
    %c0_69 = arith.constant 0 : index
    %c0_70 = arith.constant 0 : index
    %93 = vector.load %arg2[%c10, %c0_69, %c0_70] : memref<12x32x8xf32, #tpu.memory_space<vmem>>, vector<1x32x8xf32>
    %94 = vector.shape_cast %93 : vector<1x32x8xf32> to vector<32x8xf32>
    %cst_71 = arith.constant dense<0.000000e+00> : vector<6x8xf32>
    %95 = tpu.matmul %1, %94, %cst_71 {dimension_numbers = #tpu.dot_dimension_numbers<[1], [0], [0], [1], [0, 0, 1, 1], [], []>} : vector<6x32xf32>, vector<32x8xf32>, vector<6x8xf32> -> vector<6x8xf32>
    %c10_72 = arith.constant 10 : index
    %c0_73 = arith.constant 0 : index
    %c0_74 = arith.constant 0 : index
    %96 = vector.load %arg3[%c10_72, %c0_73, %c0_74] : memref<12x1x8xf32, #tpu.memory_space<vmem>>, vector<1x1x8xf32>
    %97 = vector.shape_cast %96 : vector<1x1x8xf32> to vector<1x8xf32>
    %98 = vector.broadcast %97 : vector<1x8xf32> to vector<6x8xf32>
    %99 = arith.addf %95, %98 : vector<6x8xf32>
    %cst_75 = arith.constant dense<0.000000e+00> : vector<6x6xf32>
    %100 = tpu.matmul %85, %92, %cst_75 {dimension_numbers = #tpu.dot_dimension_numbers<[1], [1], [0], [0], [0, 0, 1, 0], [], []>} : vector<6x8xf32>, vector<6x8xf32>, vector<6x6xf32> -> vector<6x6xf32>
    %cst_76 = arith.constant 0.353553385 : f32
    %101 = vector.broadcast %cst_76 : f32 to vector<6x6xf32>
    %102 = arith.mulf %100, %101 : vector<6x6xf32>
    %cst_77 = arith.constant dense<0xFF800000> : vector<6xf32>
    %103 = vector.multi_reduction <maximumf>, %102, %cst_77 [1] : vector<6x6xf32> to vector<6xf32>
    %104 = vector.shape_cast %103 : vector<6xf32> to vector<6x1xf32>
    %105 = vector.broadcast %104 : vector<6x1xf32> to vector<6x6xf32>
    %106 = arith.subf %102, %105 : vector<6x6xf32>
    %107 = math.exp %106 : vector<6x6xf32>
    %cst_78 = arith.constant dense<0.000000e+00> : vector<6xf32>
    %108 = vector.multi_reduction <add>, %107, %cst_78 [1] : vector<6x6xf32> to vector<6xf32>
    %109 = vector.shape_cast %108 : vector<6xf32> to vector<6x1xf32>
    %110 = vector.broadcast %109 : vector<6x1xf32> to vector<6x6xf32>
    %111 = arith.divf %107, %110 : vector<6x6xf32>
    %cst_79 = arith.constant dense<0.000000e+00> : vector<6x8xf32>
    %112 = tpu.matmul %111, %99, %cst_79 {dimension_numbers = #tpu.dot_dimension_numbers<[1], [0], [0], [1], [0, 0, 1, 1], [], []>} : vector<6x6xf32>, vector<6x8xf32>, vector<6x8xf32> -> vector<6x8xf32>
    %c2_80 = arith.constant 2 : index
    %c0_81 = arith.constant 0 : index
    %c0_82 = arith.constant 0 : index
    %113 = vector.load %arg4[%c2_80, %c0_81, %c0_82] : memref<4x8x32xf32, #tpu.memory_space<vmem>>, vector<1x8x32xf32>
    %114 = vector.shape_cast %113 : vector<1x8x32xf32> to vector<8x32xf32>
    %cst_83 = arith.constant dense<0.000000e+00> : vector<6x32xf32>
    %115 = tpu.matmul %112, %114, %cst_83 {dimension_numbers = #tpu.dot_dimension_numbers<[1], [0], [0], [1], [0, 0, 1, 1], [], []>} : vector<6x8xf32>, vector<8x32xf32>, vector<6x32xf32> -> vector<6x32xf32>
    %116 = arith.addf %78, %115 : vector<6x32xf32>
    %c3 = arith.constant 3 : index
    %c0_84 = arith.constant 0 : index
    %c0_85 = arith.constant 0 : index
    %117 = vector.load %arg2[%c3, %c0_84, %c0_85] : memref<12x32x8xf32, #tpu.memory_space<vmem>>, vector<1x32x8xf32>
    %118 = vector.shape_cast %117 : vector<1x32x8xf32> to vector<32x8xf32>
    %cst_86 = arith.constant dense<0.000000e+00> : vector<6x8xf32>
    %119 = tpu.matmul %1, %118, %cst_86 {dimension_numbers = #tpu.dot_dimension_numbers<[1], [0], [0], [1], [0, 0, 1, 1], [], []>} : vector<6x32xf32>, vector<32x8xf32>, vector<6x8xf32> -> vector<6x8xf32>
    %c3_87 = arith.constant 3 : index
    %c0_88 = arith.constant 0 : index
    %c0_89 = arith.constant 0 : index
    %120 = vector.load %arg3[%c3_87, %c0_88, %c0_89] : memref<12x1x8xf32, #tpu.memory_space<vmem>>, vector<1x1x8xf32>
    %121 = vector.shape_cast %120 : vector<1x1x8xf32> to vector<1x8xf32>
    %122 = vector.broadcast %121 : vector<1x8xf32> to vector<6x8xf32>
    %123 = arith.addf %119, %122 : vector<6x8xf32>
    %c7 = arith.constant 7 : index
    %c0_90 = arith.constant 0 : index
    %c0_91 = arith.constant 0 : index
    %124 = vector.load %arg2[%c7, %c0_90, %c0_91] : memref<12x32x8xf32, #tpu.memory_space<vmem>>, vector<1x32x8xf32>
    %125 = vector.shape_cast %124 : vector<1x32x8xf32> to vector<32x8xf32>
    %cst_92 = arith.constant dense<0.000000e+00> : vector<6x8xf32>
    %126 = tpu.matmul %1, %125, %cst_92 {dimension_numbers = #tpu.dot_dimension_numbers<[1], [0], [0], [1], [0, 0, 1, 1], [], []>} : vector<6x32xf32>, vector<32x8xf32>, vector<6x8xf32> -> vector<6x8xf32>
    %c7_93 = arith.constant 7 : index
    %c0_94 = arith.constant 0 : index
    %c0_95 = arith.constant 0 : index
    %127 = vector.load %arg3[%c7_93, %c0_94, %c0_95] : memref<12x1x8xf32, #tpu.memory_space<vmem>>, vector<1x1x8xf32>
    %128 = vector.shape_cast %127 : vector<1x1x8xf32> to vector<1x8xf32>
    %129 = vector.broadcast %128 : vector<1x8xf32> to vector<6x8xf32>
    %130 = arith.addf %126, %129 : vector<6x8xf32>
    %c11 = arith.constant 11 : index
    %c0_96 = arith.constant 0 : index
    %c0_97 = arith.constant 0 : index
    %131 = vector.load %arg2[%c11, %c0_96, %c0_97] : memref<12x32x8xf32, #tpu.memory_space<vmem>>, vector<1x32x8xf32>
    %132 = vector.shape_cast %131 : vector<1x32x8xf32> to vector<32x8xf32>
    %cst_98 = arith.constant dense<0.000000e+00> : vector<6x8xf32>
    %133 = tpu.matmul %1, %132, %cst_98 {dimension_numbers = #tpu.dot_dimension_numbers<[1], [0], [0], [1], [0, 0, 1, 1], [], []>} : vector<6x32xf32>, vector<32x8xf32>, vector<6x8xf32> -> vector<6x8xf32>
    %c11_99 = arith.constant 11 : index
    %c0_100 = arith.constant 0 : index
    %c0_101 = arith.constant 0 : index
    %134 = vector.load %arg3[%c11_99, %c0_100, %c0_101] : memref<12x1x8xf32, #tpu.memory_space<vmem>>, vector<1x1x8xf32>
    %135 = vector.shape_cast %134 : vector<1x1x8xf32> to vector<1x8xf32>
    %136 = vector.broadcast %135 : vector<1x8xf32> to vector<6x8xf32>
    %137 = arith.addf %133, %136 : vector<6x8xf32>
    %cst_102 = arith.constant dense<0.000000e+00> : vector<6x6xf32>
    %138 = tpu.matmul %123, %130, %cst_102 {dimension_numbers = #tpu.dot_dimension_numbers<[1], [1], [0], [0], [0, 0, 1, 0], [], []>} : vector<6x8xf32>, vector<6x8xf32>, vector<6x6xf32> -> vector<6x6xf32>
    %cst_103 = arith.constant 0.353553385 : f32
    %139 = vector.broadcast %cst_103 : f32 to vector<6x6xf32>
    %140 = arith.mulf %138, %139 : vector<6x6xf32>
    %cst_104 = arith.constant dense<0xFF800000> : vector<6xf32>
    %141 = vector.multi_reduction <maximumf>, %140, %cst_104 [1] : vector<6x6xf32> to vector<6xf32>
    %142 = vector.shape_cast %141 : vector<6xf32> to vector<6x1xf32>
    %143 = vector.broadcast %142 : vector<6x1xf32> to vector<6x6xf32>
    %144 = arith.subf %140, %143 : vector<6x6xf32>
    %145 = math.exp %144 : vector<6x6xf32>
    %cst_105 = arith.constant dense<0.000000e+00> : vector<6xf32>
    %146 = vector.multi_reduction <add>, %145, %cst_105 [1] : vector<6x6xf32> to vector<6xf32>
    %147 = vector.shape_cast %146 : vector<6xf32> to vector<6x1xf32>
    %148 = vector.broadcast %147 : vector<6x1xf32> to vector<6x6xf32>
    %149 = arith.divf %145, %148 : vector<6x6xf32>
    %cst_106 = arith.constant dense<0.000000e+00> : vector<6x8xf32>
    %150 = tpu.matmul %149, %137, %cst_106 {dimension_numbers = #tpu.dot_dimension_numbers<[1], [0], [0], [1], [0, 0, 1, 1], [], []>} : vector<6x6xf32>, vector<6x8xf32>, vector<6x8xf32> -> vector<6x8xf32>
    %c3_107 = arith.constant 3 : index
    %c0_108 = arith.constant 0 : index
    %c0_109 = arith.constant 0 : index
    %151 = vector.load %arg4[%c3_107, %c0_108, %c0_109] : memref<4x8x32xf32, #tpu.memory_space<vmem>>, vector<1x8x32xf32>
    %152 = vector.shape_cast %151 : vector<1x8x32xf32> to vector<8x32xf32>
    %cst_110 = arith.constant dense<0.000000e+00> : vector<6x32xf32>
    %153 = tpu.matmul %150, %152, %cst_110 {dimension_numbers = #tpu.dot_dimension_numbers<[1], [0], [0], [1], [0, 0, 1, 1], [], []>} : vector<6x8xf32>, vector<8x32xf32>, vector<6x32xf32> -> vector<6x32xf32>
    %154 = arith.addf %116, %153 : vector<6x32xf32>
    %c0_111 = arith.constant 0 : index
    %c0_112 = arith.constant 0 : index
    %155 = vector.load %arg5[%c0_111, %c0_112] : memref<1x32xf32, #tpu.memory_space<vmem>>, vector<1x32xf32>
    %156 = vector.broadcast %155 : vector<1x32xf32> to vector<6x32xf32>
    %157 = arith.addf %154, %156 : vector<6x32xf32>
    %158 = arith.addf %1, %157 : vector<6x32xf32>
    %cst_113 = arith.constant dense<0.000000e+00> : vector<6xf32>
    %159 = vector.multi_reduction <add>, %158, %cst_113 [1] : vector<6x32xf32> to vector<6xf32>
    %160 = vector.shape_cast %159 : vector<6xf32> to vector<6x1xf32>
    %cst_114 = arith.constant 3.200000e+01 : f32
    %161 = vector.broadcast %cst_114 : f32 to vector<6x1xf32>
    %162 = arith.divf %160, %161 : vector<6x1xf32>
    %163 = vector.broadcast %162 : vector<6x1xf32> to vector<6x32xf32>
    %164 = arith.subf %158, %163 : vector<6x32xf32>
    %165 = arith.mulf %164, %164 : vector<6x32xf32>
    %cst_115 = arith.constant dense<0.000000e+00> : vector<6xf32>
    %166 = vector.multi_reduction <add>, %165, %cst_115 [1] : vector<6x32xf32> to vector<6xf32>
    %167 = vector.shape_cast %166 : vector<6xf32> to vector<6x1xf32>
    %cst_116 = arith.constant 3.200000e+01 : f32
    %168 = vector.broadcast %cst_116 : f32 to vector<6x1xf32>
    %169 = arith.divf %167, %168 : vector<6x1xf32>
    %cst_117 = arith.constant 9.99999974E-6 : f32
    %170 = vector.broadcast %cst_117 : f32 to vector<6x1xf32>
    %171 = arith.addf %169, %170 : vector<6x1xf32>
    %172 = math.rsqrt %171 : vector<6x1xf32>
    %173 = vector.broadcast %172 : vector<6x1xf32> to vector<6x32xf32>
    %174 = arith.mulf %164, %173 : vector<6x32xf32>
    %c0_118 = arith.constant 0 : index
    %c0_119 = arith.constant 0 : index
    %175 = vector.load %arg6[%c0_118, %c0_119] : memref<1x32xf32, #tpu.memory_space<vmem>>, vector<1x32xf32>
    %176 = vector.broadcast %175 : vector<1x32xf32> to vector<6x32xf32>
    %177 = arith.mulf %174, %176 : vector<6x32xf32>
    %c0_120 = arith.constant 0 : index
    %c0_121 = arith.constant 0 : index
    %178 = vector.load %arg7[%c0_120, %c0_121] : memref<1x32xf32, #tpu.memory_space<vmem>>, vector<1x32xf32>
    %179 = vector.broadcast %178 : vector<1x32xf32> to vector<6x32xf32>
    %180 = arith.addf %177, %179 : vector<6x32xf32>
    %c0_122 = arith.constant 0 : index
    %c0_123 = arith.constant 0 : index
    %181 = vector.load %arg8[%c0_122, %c0_123] : memref<32x64xf32, #tpu.memory_space<vmem>>, vector<32x64xf32>
    %cst_124 = arith.constant dense<0.000000e+00> : vector<6x64xf32>
    %182 = tpu.matmul %180, %181, %cst_124 {dimension_numbers = #tpu.dot_dimension_numbers<[1], [0], [0], [1], [0, 0, 1, 1], [], []>} : vector<6x32xf32>, vector<32x64xf32>, vector<6x64xf32> -> vector<6x64xf32>
    %c0_125 = arith.constant 0 : index
    %c0_126 = arith.constant 0 : index
    %183 = vector.load %arg9[%c0_125, %c0_126] : memref<1x64xf32, #tpu.memory_space<vmem>>, vector<1x64xf32>
    %184 = vector.broadcast %183 : vector<1x64xf32> to vector<6x64xf32>
    %185 = arith.addf %182, %184 : vector<6x64xf32>
    %cst_127 = arith.constant 0.000000e+00 : f32
    %186 = vector.broadcast %cst_127 : f32 to vector<6x64xf32>
    %187 = arith.maximumf %185, %186 : vector<6x64xf32>
    %c0_128 = arith.constant 0 : index
    %c0_129 = arith.constant 0 : index
    %188 = vector.load %arg10[%c0_128, %c0_129] : memref<64x32xf32, #tpu.memory_space<vmem>>, vector<64x32xf32>
    %cst_130 = arith.constant dense<0.000000e+00> : vector<6x32xf32>
    %189 = tpu.matmul %187, %188, %cst_130 {dimension_numbers = #tpu.dot_dimension_numbers<[1], [0], [0], [1], [0, 0, 1, 1], [], []>} : vector<6x64xf32>, vector<64x32xf32>, vector<6x32xf32> -> vector<6x32xf32>
    %c0_131 = arith.constant 0 : index
    %c0_132 = arith.constant 0 : index
    %190 = vector.load %arg11[%c0_131, %c0_132] : memref<1x32xf32, #tpu.memory_space<vmem>>, vector<1x32xf32>
    %191 = vector.broadcast %190 : vector<1x32xf32> to vector<6x32xf32>
    %192 = arith.addf %189, %191 : vector<6x32xf32>
    %193 = arith.addf %180, %192 : vector<6x32xf32>
    %cst_133 = arith.constant dense<0.000000e+00> : vector<6xf32>
    %194 = vector.multi_reduction <add>, %193, %cst_133 [1] : vector<6x32xf32> to vector<6xf32>
    %195 = vector.shape_cast %194 : vector<6xf32> to vector<6x1xf32>
    %cst_134 = arith.constant 3.200000e+01 : f32
    %196 = vector.broadcast %cst_134 : f32 to vector<6x1xf32>
    %197 = arith.divf %195, %196 : vector<6x1xf32>
    %198 = vector.broadcast %197 : vector<6x1xf32> to vector<6x32xf32>
    %199 = arith.subf %193, %198 : vector<6x32xf32>
    %200 = arith.mulf %199, %199 : vector<6x32xf32>
    %cst_135 = arith.constant dense<0.000000e+00> : vector<6xf32>
    %201 = vector.multi_reduction <add>, %200, %cst_135 [1] : vector<6x32xf32> to vector<6xf32>
    %202 = vector.shape_cast %201 : vector<6xf32> to vector<6x1xf32>
    %cst_136 = arith.constant 3.200000e+01 : f32
    %203 = vector.broadcast %cst_136 : f32 to vector<6x1xf32>
    %204 = arith.divf %202, %203 : vector<6x1xf32>
    %cst_137 = arith.constant 9.99999974E-6 : f32
    %205 = vector.broadcast %cst_137 : f32 to vector<6x1xf32>
    %206 = arith.addf %204, %205 : vector<6x1xf32>
    %207 = math.rsqrt %206 : vector<6x1xf32>
    %208 = vector.broadcast %207 : vector<6x1xf32> to vector<6x32xf32>
    %209 = arith.mulf %199, %208 : vector<6x32xf32>
    %c0_138 = arith.constant 0 : index
    %c0_139 = arith.constant 0 : index
    %210 = vector.load %arg12[%c0_138, %c0_139] : memref<1x32xf32, #tpu.memory_space<vmem>>, vector<1x32xf32>
    %211 = vector.broadcast %210 : vector<1x32xf32> to vector<6x32xf32>
    %212 = arith.mulf %209, %211 : vector<6x32xf32>
    %c0_140 = arith.constant 0 : index
    %c0_141 = arith.constant 0 : index
    %213 = vector.load %arg13[%c0_140, %c0_141] : memref<1x32xf32, #tpu.memory_space<vmem>>, vector<1x32xf32>
    %214 = vector.broadcast %213 : vector<1x32xf32> to vector<6x32xf32>
    %215 = arith.addf %212, %214 : vector<6x32xf32>
    %c0_142 = arith.constant 0 : index
    %c0_143 = arith.constant 0 : index
    %c0_144 = arith.constant 0 : index
    %216 = vector.load %arg14[%c0_142, %c0_143, %c0_144] : memref<1x6x32xf32, #tpu.memory_space<vmem>>, vector<1x6x32xf32>
    %217 = vector.shape_cast %216 : vector<1x6x32xf32> to vector<6x32xf32>
    %218 = vector.shape_cast %215 : vector<6x32xf32> to vector<1x6x32xf32>
    tpu.vector_store %arg14[%c0_142, %c0_143, %c0_144], %218 {strides = array<i32>} : memref<1x6x32xf32, #tpu.memory_space<vmem>>, vector<1x6x32xf32>,
    return
  }
  func.func @transform_0(%arg0: i32) -> (i32, i32, i32) {
    %c0_i32 = arith.constant 0 : i32
    %c0_i32_0 = arith.constant 0 : i32
    %c0_i32_1 = arith.constant 0 : i32
    return %arg0, %c0_i32, %c0_i32_0 : i32, i32, i32
  }
  func.func @transform_1(%arg0: i32) -> (i32, i32, i32) {
    %c0_i32 = arith.constant 0 : i32
    %c0_i32_0 = arith.constant 0 : i32
    %c0_i32_1 = arith.constant 0 : i32
    %c0_i32_2 = arith.constant 0 : i32
    return %c0_i32, %c0_i32_0, %c0_i32_1 : i32, i32, i32
  }
  func.func @transform_2(%arg0: i32) -> (i32, i32, i32) {
    %c0_i32 = arith.constant 0 : i32
    %c0_i32_0 = arith.constant 0 : i32
    %c0_i32_1 = arith.constant 0 : i32
    %c0_i32_2 = arith.constant 0 : i32
    return %c0_i32, %c0_i32_0, %c0_i32_1 : i32, i32, i32
  }
  func.func @transform_3(%arg0: i32) -> (i32, i32, i32) {
    %c0_i32 = arith.constant 0 : i32
    %c0_i32_0 = arith.constant 0 : i32
    %c0_i32_1 = arith.constant 0 : i32
    %c0_i32_2 = arith.constant 0 : i32
    return %c0_i32, %c0_i32_0, %c0_i32_1 : i32, i32, i32
  }
  func.func @transform_4(%arg0: i32) -> (i32, i32) {
    %c0_i32 = arith.constant 0 : i32
    %c0_i32_0 = arith.constant 0 : i32
    %c0_i32_1 = arith.constant 0 : i32
    return %c0_i32, %c0_i32_0 : i32, i32
  }
  func.func @transform_5(%arg0: i32) -> (i32, i32) {
    %c0_i32 = arith.constant 0 : i32
    %c0_i32_0 = arith.constant 0 : i32
    %c0_i32_1 = arith.constant 0 : i32
    return %c0_i32, %c0_i32_0 : i32, i32
  }
  func.func @transform_6(%arg0: i32) -> (i32, i32) {
    %c0_i32 = arith.constant 0 : i32
    %c0_i32_0 = arith.constant 0 : i32
    %c0_i32_1 = arith.constant 0 : i32
    return %c0_i32, %c0_i32_0 : i32, i32
  }
  func.func @transform_7(%arg0: i32) -> (i32, i32) {
    %c0_i32 = arith.constant 0 : i32
    %c0_i32_0 = arith.constant 0 : i32
    %c0_i32_1 = arith.constant 0 : i32
    return %c0_i32, %c0_i32_0 : i32, i32
  }
  func.func @transform_8(%arg0: i32) -> (i32, i32) {
    %c0_i32 = arith.constant 0 : i32
    %c0_i32_0 = arith.constant 0 : i32
    %c0_i32_1 = arith.constant 0 : i32
    return %c0_i32, %c0_i32_0 : i32, i32
  }
  func.func @transform_9(%arg0: i32) -> (i32, i32) {
    %c0_i32 = arith.constant 0 : i32
    %c0_i32_0 = arith.constant 0 : i32
    %c0_i32_1 = arith.constant 0 : i32
    return %c0_i32, %c0_i32_0 : i32, i32
  }
  func.func @transform_10(%arg0: i32) -> (i32, i32) {
    %c0_i32 = arith.constant 0 : i32
    %c0_i32_0 = arith.constant 0 : i32
    %c0_i32_1 = arith.constant 0 : i32
    return %c0_i32, %c0_i32_0 : i32, i32
  }
  func.func @transform_11(%arg0: i32) -> (i32, i32) {
    %c0_i32 = arith.constant 0 : i32
    %c0_i32_0 = arith.constant 0 : i32
    %c0_i32_1 = arith.constant 0 : i32
    return %c0_i32, %c0_i32_0 : i32, i32
  }
  func.func @transform_12(%arg0: i32) -> (i32, i32) {
    %c0_i32 = arith.constant 0 : i32
    %c0_i32_0 = arith.constant 0 : i32
    %c0_i32_1 = arith.constant 0 : i32
    return %c0_i32, %c0_i32_0 : i32, i32
  }
  func.func @transform_13(%arg0: i32) -> (i32, i32, i32) {
    %c0_i32 = arith.constant 0 : i32
    %c0_i32_0 = arith.constant 0 : i32
    %c0_i32_1 = arith.constant 0 : i32
    return %arg0, %c0_i32, %c0_i32_0 : i32, i32, i32
  }
}

module attributes {stable_mosaic.version = 11 : i64} {
  func.func @_head_kernel(%arg0: i32, %arg1: memref<1x6x32xf32, #tpu.memory_space<vmem>>, %arg2: memref<1x32xf32, #tpu.memory_space<vmem>>, %arg3: memref<1x32xf32, #tpu.memory_space<vmem>>, %arg4: memref<32x8xf32, #tpu.memory_space<vmem>>, %arg5: memref<1x8xf32, #tpu.memory_space<vmem>>, %arg6: memref<1x4x1xf32, #tpu.memory_space<vmem>>, %arg7: memref<1x4x1xf32, #tpu.memory_space<vmem>>, %arg8: memref<1x4x8xf32, #tpu.memory_space<vmem>>) attributes {dimension_semantics = [#tpu.dimension_semantics<parallel>], iteration_bounds = array<i64: 2>, scalar_prefetch = 0 : i64, scratch_operands = 0 : i64, tpu.core_type = #tpu.core_type<tc>, window_params = [{transform_indices = @transform_0, window_bounds = array<i64: 1, 6, 32>}, {pipeline_mode = #tpu.pipeline_mode<synchronous>, transform_indices = @transform_1, window_bounds = array<i64: 1, 32>}, {pipeline_mode = #tpu.pipeline_mode<synchronous>, transform_indices = @transform_2, window_bounds = array<i64: 1, 32>}, {pipeline_mode = #tpu.pipeline_mode<synchronous>, transform_indices = @transform_3, window_bounds = array<i64: 32, 8>}, {pipeline_mode = #tpu.pipeline_mode<synchronous>, transform_indices = @transform_4, window_bounds = array<i64: 1, 8>}, {transform_indices = @transform_5, window_bounds = array<i64: 1, 4, 1>}, {transform_indices = @transform_6, window_bounds = array<i64: 1, 4, 1>}, {transform_indices = @transform_7, window_bounds = array<i64: 1, 4, 8>}]} {
    %c0 = arith.constant 0 : index
    %c0_0 = arith.constant 0 : index
    %c0_1 = arith.constant 0 : index
    %0 = vector.load %arg1[%c0, %c0_0, %c0_1] : memref<1x6x32xf32, #tpu.memory_space<vmem>>, vector<1x6x32xf32>
    %1 = vector.shape_cast %0 : vector<1x6x32xf32> to vector<6x32xf32>
    %cst = arith.constant dense<0.000000e+00> : vector<6xf32>
    %2 = vector.multi_reduction <add>, %1, %cst [1] : vector<6x32xf32> to vector<6xf32>
    %3 = vector.shape_cast %2 : vector<6xf32> to vector<6x1xf32>
    %cst_2 = arith.constant 3.200000e+01 : f32
    %4 = vector.broadcast %cst_2 : f32 to vector<6x1xf32>
    %5 = arith.divf %3, %4 : vector<6x1xf32>
    %6 = vector.broadcast %5 : vector<6x1xf32> to vector<6x32xf32>
    %7 = arith.subf %1, %6 : vector<6x32xf32>
    %8 = arith.mulf %7, %7 : vector<6x32xf32>
    %cst_3 = arith.constant dense<0.000000e+00> : vector<6xf32>
    %9 = vector.multi_reduction <add>, %8, %cst_3 [1] : vector<6x32xf32> to vector<6xf32>
    %10 = vector.shape_cast %9 : vector<6xf32> to vector<6x1xf32>
    %cst_4 = arith.constant 3.200000e+01 : f32
    %11 = vector.broadcast %cst_4 : f32 to vector<6x1xf32>
    %12 = arith.divf %10, %11 : vector<6x1xf32>
    %cst_5 = arith.constant 9.99999974E-6 : f32
    %13 = vector.broadcast %cst_5 : f32 to vector<6x1xf32>
    %14 = arith.addf %12, %13 : vector<6x1xf32>
    %15 = math.rsqrt %14 : vector<6x1xf32>
    %16 = vector.broadcast %15 : vector<6x1xf32> to vector<6x32xf32>
    %17 = arith.mulf %7, %16 : vector<6x32xf32>
    %c0_6 = arith.constant 0 : index
    %c0_7 = arith.constant 0 : index
    %18 = vector.load %arg2[%c0_6, %c0_7] : memref<1x32xf32, #tpu.memory_space<vmem>>, vector<1x32xf32>
    %19 = vector.broadcast %18 : vector<1x32xf32> to vector<6x32xf32>
    %20 = arith.mulf %17, %19 : vector<6x32xf32>
    %c0_8 = arith.constant 0 : index
    %c0_9 = arith.constant 0 : index
    %21 = vector.load %arg3[%c0_8, %c0_9] : memref<1x32xf32, #tpu.memory_space<vmem>>, vector<1x32xf32>
    %22 = vector.broadcast %21 : vector<1x32xf32> to vector<6x32xf32>
    %23 = arith.addf %20, %22 : vector<6x32xf32>
    %c0_10 = arith.constant 0 : index
    %c0_11 = arith.constant 0 : index
    %24 = vector.load %arg4[%c0_10, %c0_11] : memref<32x8xf32, #tpu.memory_space<vmem>>, vector<32x8xf32>
    %cst_12 = arith.constant dense<0.000000e+00> : vector<6x8xf32>
    %25 = tpu.matmul %23, %24, %cst_12 {dimension_numbers = #tpu.dot_dimension_numbers<[1], [0], [0], [1], [0, 0, 1, 1], [], []>} : vector<6x32xf32>, vector<32x8xf32>, vector<6x8xf32> -> vector<6x8xf32>
    %c0_13 = arith.constant 0 : index
    %c0_14 = arith.constant 0 : index
    %26 = vector.load %arg5[%c0_13, %c0_14] : memref<1x8xf32, #tpu.memory_space<vmem>>, vector<1x8xf32>
    %27 = vector.broadcast %26 : vector<1x8xf32> to vector<6x8xf32>
    %28 = arith.addf %25, %27 : vector<6x8xf32>
    %29 = vector.extract_strided_slice %28 {offsets = [0, 0], sizes = [4, 8], strides = [1, 1]} : vector<6x8xf32> to vector<4x8xf32>
    %c0_15 = arith.constant 0 : index
    %c0_16 = arith.constant 0 : index
    %c0_17 = arith.constant 0 : index
    %30 = vector.load %arg7[%c0_15, %c0_16, %c0_17] : memref<1x4x1xf32, #tpu.memory_space<vmem>>, vector<1x4x1xf32>
    %31 = vector.shape_cast %30 : vector<1x4x1xf32> to vector<4x1xf32>
    %32 = vector.broadcast %31 : vector<4x1xf32> to vector<4x8xf32>
    %33 = arith.mulf %29, %32 : vector<4x8xf32>
    %c0_18 = arith.constant 0 : index
    %c0_19 = arith.constant 0 : index
    %c0_20 = arith.constant 0 : index
    %34 = vector.load %arg6[%c0_18, %c0_19, %c0_20] : memref<1x4x1xf32, #tpu.memory_space<vmem>>, vector<1x4x1xf32>
    %35 = vector.shape_cast %34 : vector<1x4x1xf32> to vector<4x1xf32>
    %36 = vector.broadcast %35 : vector<4x1xf32> to vector<4x8xf32>
    %37 = arith.addf %33, %36 : vector<4x8xf32>
    %c0_21 = arith.constant 0 : index
    %c0_22 = arith.constant 0 : index
    %c0_23 = arith.constant 0 : index
    %38 = vector.load %arg8[%c0_21, %c0_22, %c0_23] : memref<1x4x8xf32, #tpu.memory_space<vmem>>, vector<1x4x8xf32>
    %39 = vector.shape_cast %38 : vector<1x4x8xf32> to vector<4x8xf32>
    %40 = vector.shape_cast %37 : vector<4x8xf32> to vector<1x4x8xf32>
    tpu.vector_store %arg8[%c0_21, %c0_22, %c0_23], %40 {strides = array<i32>} : memref<1x4x8xf32, #tpu.memory_space<vmem>>, vector<1x4x8xf32>,
    return
  }
  func.func @transform_0(%arg0: i32) -> (i32, i32, i32) {
    %c0_i32 = arith.constant 0 : i32
    %c0_i32_0 = arith.constant 0 : i32
    %c0_i32_1 = arith.constant 0 : i32
    return %arg0, %c0_i32, %c0_i32_0 : i32, i32, i32
  }
  func.func @transform_1(%arg0: i32) -> (i32, i32) {
    %c0_i32 = arith.constant 0 : i32
    %c0_i32_0 = arith.constant 0 : i32
    %c0_i32_1 = arith.constant 0 : i32
    return %c0_i32, %c0_i32_0 : i32, i32
  }
  func.func @transform_2(%arg0: i32) -> (i32, i32) {
    %c0_i32 = arith.constant 0 : i32
    %c0_i32_0 = arith.constant 0 : i32
    %c0_i32_1 = arith.constant 0 : i32
    return %c0_i32, %c0_i32_0 : i32, i32
  }
  func.func @transform_3(%arg0: i32) -> (i32, i32) {
    %c0_i32 = arith.constant 0 : i32
    %c0_i32_0 = arith.constant 0 : i32
    %c0_i32_1 = arith.constant 0 : i32
    return %c0_i32, %c0_i32_0 : i32, i32
  }
  func.func @transform_4(%arg0: i32) -> (i32, i32) {
    %c0_i32 = arith.constant 0 : i32
    %c0_i32_0 = arith.constant 0 : i32
    %c0_i32_1 = arith.constant 0 : i32
    return %c0_i32, %c0_i32_0 : i32, i32
  }
  func.func @transform_5(%arg0: i32) -> (i32, i32, i32) {
    %c0_i32 = arith.constant 0 : i32
    %c0_i32_0 = arith.constant 0 : i32
    %c0_i32_1 = arith.constant 0 : i32
    return %arg0, %c0_i32, %c0_i32_0 : i32, i32, i32
  }
  func.func @transform_6(%arg0: i32) -> (i32, i32, i32) {
    %c0_i32 = arith.constant 0 : i32
    %c0_i32_0 = arith.constant 0 : i32
    %c0_i32_1 = arith.constant 0 : i32
    return %arg0, %c0_i32, %c0_i32_0 : i32, i32, i32
  }
  func.func @transform_7(%arg0: i32) -> (i32, i32, i32) {
    %c0_i32 = arith.constant 0 : i32
    %c0_i32_0 = arith.constant 0 : i32
    %c0_i32_1 = arith.constant 0 : i32
    return %arg0, %c0_i32, %c0_i32_0 : i32, i32, i32
  }
}

</mosaic_0001>

<bundles_post_ra>
// kernel: itransformer_forecast.4
= control target key start
LH: loop header
LB: loop body
LE: loop exit
PB: predicated region body
PF: predicated region fallthrough
CT: control target
= control target key end

     0   :  { %s371_s12 = smov 0   ;;  %s397_s0 = inlined_call_operand.vmem [shape: f32[2,6,16], index: 0, kind: input, shape index: {}]   ;;  %s398_s1 = inlined_call_operand.vmem [shape: f32[16,32], index: 1, kind: input, shape index: {}]   ;;  %s399_s2 = inlined_call_operand.vmem [shape: f32[1,32], index: 2, kind: input, shape index: {}]   ;;  %s400_s3 = inlined_call_operand.vmem [shape: f32[2,6,32], index: 3, kind: output, shape index: {}]  }
   0x1 LB: > { %s305_s13 = sadd.s32 4294967295, %s346_s12   ;;  %p309_p0 = scmp.ge.s32.totalorder %s346_s12, 1  ;;  %s346_s12 = sphi %s371_s12, %s13_s12  }
   0x2   : > { %p136_p1 = scmp.lt.s32.totalorder %s346_s12, 3 }
   0x4   : > { %p137_p2 = pnand %p309_p0, %p136_p1 }
   0x5   : > { %v167_v0 = vld [vmem:[%s398_s1] sm:$0xff] (!%p137_p2)  ;;  %v168_v1 = vld [vmem:[%s398_s1 + $0x8] sm:$0xff] (!%p137_p2)  ;;  %p158_p3 = scmp.lt.s32.totalorder (!%p137_p2), %s305_s13, 1  ;;  %v348_v2 = vmov (!%p137_p2), 0.0|0.0   ;;  %vm349_vm0 = vmmov (!%p137_p2), 0   ;;  %v350_v4 = vmov (!%p137_p2), 0.0  }
   0x6   : > { %140 = sbr.rel (%p137_p2) target bundleno = 232 (0xe8), region = 32  ;;  %326 = vmatprep.subr.bf16.mxu0 (!%p137_p2), %v348_v2  ;;  %v327_v3 = vpack.c.bf16 (!%p137_p2), %v168_v1, %v167_v0  ;;  %323 = vmatprep.mubr.msk.f32.mxu0 (!%p137_p2), %vm349_vm0, %v350_v4  ;;  %vm176_vm1 = vcmask (!%p137_p2), 130048   ;;  %v312_v6 = vld [vmem:[%s399_s2] ss:$0 sm:$0xff] (!%p137_p2)  ;;  %vm250_vm2 = vcmask (!%p137_p2), 259072  }
   0x8   : > { %328 = vmatpush3.bf16.msra.mxu0 (!%p137_p2), %v327_v3 }
   0xd   : > { %s402_s13 = smov (!%p158_p3, %s305_s13), 1 }
   0xe   : > { %s310_s18 = sshll.u32 %s402_s13, 3 }
   0xf   : > { %s161_s21 = scalar_lea.vmem %s397_s0, %s310_s18  ;;  %s165_s26 = scalar_lea.vmem %s400_s3, %s310_s18 }
  0x10   : > { %v166_v5 = vld [vmem:[%s161_s21] sm:$0x3f] }
  0x11   : > { %324 = vmatmul.mubr.msk.f32.vlgmr.msra.gmra.mrb[0].mxu0 %vm176_vm1, %v166_v5 }
  0xe4   : > { %v246_v7 = vpop.f32.mrb[0].mxu0 }
  0xe5   : > { %v247_v8 = vadd.f32 %v312_v6, %v246_v7  ;;  %v325_v9 = vpop.f32.mrb[1].mxu0 }
  0xe7   : > { %251 = vst.msk [vmem:[%s165_s26] sm:$0x3f] %vm250_vm2, %v247_v8 }
  0xe8 PF: > { %s13_s12 = sadd.s32 1, %s346_s12  }
  0xe9   : > { %p10_p4 = scmp.ge.s32.totalorder %s13_s12, 4  }
  0xeb   :  { %12 = sbr.rel (!%p10_p4) target bundleno = 1 (0x1), region = 62 }

// kernel: itransformer_forecast.7
= control target key start
LH: loop header
LB: loop body
LE: loop exit
PB: predicated region body
PF: predicated region fallthrough
CT: control target
= control target key end

     0   :  { %12 = vsyncpa [#allocation3], 0  ;;  %s863_s0 = inlined_call_operand.vmem [shape: f32[2,6,32], index: 0, kind: input, shape index: {}]   ;;  %s864_s1 = inlined_call_operand.vmem [shape: f32[1,32], index: 1, kind: input, shape index: {}]   ;;  %s865_s2 = inlined_call_operand.vmem [shape: f32[1,32], index: 2, kind: input, shape index: {}]   ;;  %s866_s3 = inlined_call_operand.vmem [shape: f32[32,8], index: 3, kind: input, shape index: {}]   ;;  %s867_s4 = inlined_call_operand.vmem [shape: f32[1,8], index: 4, kind: input, shape index: {}]   ;;  %s868_s5 = inlined_call_operand.vmem [shape: f32[2,4,1], index: 5, kind: input, shape index: {}]   ;;  %s869_s6 = inlined_call_operand.vmem [shape: f32[2,4,1], index: 6, kind: input, shape index: {}]   ;;  %s870_s7 = inlined_call_operand.hbm [shape: f32[2,4,8], index: 7, kind: output, shape index: {}]  }
   0x1   :  { %14 = vsyncpa [#allocation3 + $0x1], 0  ;;  %s732_s24 = smov 0   ;;  %s734_s25 = smov 0  }
   0x2   :  { %s736_s26 = smov 0   ;;  %s738_s27 = smov 0  }
   0x3 LB: > { %s753_s28 = sadd.s32 4294967295, %s685_s27   ;;  %s538_s29 = sadd.s32 4294967294, %s685_s27   ;;  %s685_s27 = sphi %s738_s27, %s876_s27   ;;  %s681_s26 = sphi %s736_s26, %s875_s26   ;;  %s677_s25 = sphi %s734_s25, %s874_s25   ;;  %s673_s24 = sphi %s732_s24, %s873_s24  }
   0x4   : > { %s757_s30 = sadd.s32 1, %s685_s27   ;;  %s189_s8 = sadd.s32 1, %s681_s26 }
   0x5   : > { %s186_s9 = ssub.s32 %s685_s27, %s757_s30  ;;  %p199_p0 = scmp.ne.s32.totalorder %s681_s26, %s677_s25 }
   0x6   : > { %p187_p1 = scmp.eq.s32.totalorder %s186_s9, 0  ;;  %p200_p2 = scmp.eq.s32.totalorder %s753_s28, 1 }
   0x7   : > { %p205_p3 = scmp.ne.s32.totalorder %s677_s25, %s673_s24  ;;  %p206_p4 = scmp.eq.s32.totalorder %s538_s29, 1 }
   0x8   : > { %s768_s10 = scalar_select %p187_p1, %s681_s26, %s189_s8  }
   0x9   : > { %p770_p5 = por %p200_p2, %p199_p0  ;;  %p774_p6 = por %p206_p4, %p205_p3 }
   0xa   : > { %p541_p7 = scmp.ge.s32.totalorder %s685_s27, 1  ;;  %p257_p8 = scmp.lt.s32.totalorder %s685_s27, 3 }
   0xc   : > { %p258_p9 = pnand %p541_p7, %p257_p8 }
   0xd   : > { %p296_p10 = scmp.lt.s32.totalorder (!%p258_p9), %s753_s28, 1  ;;  %vm309_vm0 = vcmask (!%p258_p9), 259072   ;;  %v340_v7 = vld [vmem:[%s866_s3] sm:$0xff] (!%p258_p9)  ;;  %v341_v8 = vld [vmem:[%s866_s3 + $0x8] sm:$0xff] (!%p258_p9)  ;;  %v342_v9 = vld [vmem:[%s866_s3 + $0x10] sm:$0xff] (!%p258_p9)  ;;  %v687_v10 = vmov (!%p258_p9), 0.0|0.0  }
   0xe   : > { %261 = sbr.rel (%p258_p9) target bundleno = 571 (0x23b), region = 48  ;;  %570 = vmatprep.subr.bf16.mxu0 (!%p258_p9), %v687_v10  ;;  %v571_v11 = vpack.c.bf16 (!%p258_p9), %v341_v8, %v340_v7  ;;  %v343_v12 = vld [vmem:[%s866_s3 + $0x18] sm:$0xff] (!%p258_p9)  ;;  %vm688_vm1 = vmmov (!%p258_p9), 0   ;;  %v689_v13 = vmov (!%p258_p9), 0.0   ;;  %v690_v15 = vmov (!%p258_p9), 0   ;;  %s293_s23 = sand.u32 (!%p258_p9), 1, %s677_s25  }
   0xf   : > { %567 = vmatprep.mubr.msk.f32.mxu0 (!%p258_p9), %vm688_vm1, %v689_v13  ;;  %v574_v14 = vpack.c.bf16 (!%p258_p9), %v343_v12, %v342_v9  ;;  %619 = vset.pattern.permute.xlu1 (!%p258_p9), %v690_v15  ;;  %v546_v22 = vld [vmem:[%s864_s1] ss:$0 sm:$0xff] (!%p258_p9)  ;;  %vm351_vm2 = vcmask (!%p258_p9), 261120   ;;  %s542_s29 = sshll.u32 (!%p258_p9), %s293_s23, 2  ;;  %vm439_vm3 = vcmask (!%p258_p9), 60416  }
  0x10   : > { %572 = vmatpush3.bf16.msra.mxu0 (!%p258_p9), %v571_v11  ;;  %620 = vset.pattern.permute.xlu0 (!%p258_p9), %v690_v15  ;;  %v547_v24 = vld [vmem:[%s865_s2] ss:$0 sm:$0xff] (!%p258_p9)  ;;  %s295_s15 = scalar_lea.vmem (!%p258_p9), [#allocation2], %s542_s29 }
  0x11   : > { %573 = vmatprep.subr.bf16.mxu0 (!%p258_p9), %v687_v10  ;;  %v548_v28 = vld [vmem:[%s867_s4] ss:$0 sm:$0xff] (!%p258_p9) }
  0x14   : > { %575 = vmatpush3.bf16.msra.mxu0 (!%p258_p9), %v574_v14 }
  0x15   : > { %s782_s13 = scalar_select %p296_p10, %s753_s28, 1 }
  0x17   : > { %s543_s14 = sshll.u32 %s782_s13, 3  ;;  %s544_s9 = sshll.u32 %s782_s13, 2 }
  0x18   : > { %s299_s17 = scalar_lea.vmem %s863_s0, %s543_s14  ;;  %s307_s16 = scalar_lea.vmem %s869_s6, %s544_s9 }
  0x19   : > { %v308_v0 = vld [vmem:[%s299_s17] sm:$0x3f]  ;;  %s303_s19 = scalar_lea.vmem %s868_s5, %s544_s9  ;;  %s551_s14 = sshll.u32 %s753_s28, 6 }
  0x1a   : > { %v310_v1 = vsel %vm309_vm0, %v308_v0, 0.0  ;;  %v425_v16 = vld [vmem:[%s307_s16] sm:$0xf]  ;;  %s455_s16 = sshll.u32 %s295_s15, 4  ;;  %s442_s13 = scalar_lea.sflag [#allocation3], %s293_s23  ;;  %s823_s16 = int_to_ptr.vmem [resolvable:$true] %s455_s16 }
  0x1b   : > { %311 = vadd.xlane.f32.xlu0 %v310_v1  ;;  %428 = vperm.xlu1 %619, %v425_v16   ;;  %v432_v17 = vld [vmem:[%s303_s19] sm:$0xf]  ;;  %s821_s19 = scalar_lea.hbm %s870_s7, %s551_s14  ;;  %s623_s20 = scalar_lea.vmem %s823_s16, 64 }
  0x1c   : > { %p624_p11 = scmp.ne.s32.totalorder %s823_s16, %s623_s20  ;;  %s691_s28 = smov [#allocation2]  }
  0x1d   : > { %s627_s21 = sshll.u32 %s691_s28, 4  ;;  %s628_s21 = int_to_ptr.vmem [resolvable:$false] %s627_s21 }
  0x1e   : > { %p625_p12 = pnand %p624_p11, %p770_p5  ;;  %s629_s22 = scalar_lea.vmem %s628_s21, 128 }
  0x1f   : > { %435 = vperm.xlu1 %619, %v432_v17   ;;  %p630_p0 = scmp.lt.s32.totalorder %s823_s16, %s628_s21  ;;  %p631_p1 = scmp.lt.s32.totalorder %s629_s22, %s623_s20 }
  0x20   : > { %p626_p13 = pneg %p625_p12 }
  0x21   : > { %p632_p2 = por %p631_p1, %p630_p0 }
  0x23   : > { %p633_p3 = pnand %p632_p2, %p626_p13 }
  0x9a   : > { %v429_v27 = vpop.permute.xlu1 %428 }
  0x9e   : > { %v436_v33 = vpop.permute.xlu1 %435 }
  0xa8   : > { %v312_v2 = vpop.xlane.xlu0 %311 }
  0xa9   : > { %v314_v3 = vmul.f32 0.03125, %v312_v2 }
  0xab   : > { %v315_v4 = vsub.f32 %v308_v0, %v314_v3 }
  0xad   : > { %v316_v5 = vmul.f32 %v315_v4, %v315_v4 }
  0xaf   : > { %v317_v6 = vsel %vm309_vm0, %v316_v5, 0.0 }
  0xb0   : > { %318 = vadd.xlane.f32.xlu0 %v317_v6 }
 0x13d   : > { %v319_v18 = vpop.xlane.xlu0 %318 }
 0x13e   : > { %v320_v19 = vmul.f32 0.03125, %v319_v18 }
 0x140   : > { %v321_v20 = vadd.f32 1e-05, %v320_v19 }
 0x142   : > { %621 = vrsqrt.f32 %v321_v20 }
 0x14c   : > { %v622_v21 = vpop.eup %621 }
 0x14d   : > { %v323_v23 = vmul.f32 %v622_v21, %v315_v4 }
 0x14f   : > { %v331_v25 = vmul.f32 %v546_v22, %v323_v23 }
 0x151   : > { %v339_v26 = vadd.f32 %v547_v24, %v331_v25 }
 0x153   : > { %568 = vmatmul.mubr.msk.f32.vlgmr.msra.gmra.mrb[0].mxu0 %vm351_vm2, %v339_v26 }
 0x226   : > { %v421_v29 = vpop.f32.mrb[0].mxu0 }
 0x227   : > { %v422_v30 = vadd.f32 %v548_v28, %v421_v29  ;;  %v569_v31 = vpop.f32.mrb[1].mxu0 }
 0x229   : > { %v431_v32 = vmul.f32 %v429_v27, %v422_v30 }
 0x22b   : > { %v438_v34 = vadd.f32 %v436_v33, %v431_v32 }
 0x22d   : > { %440 = vst.msk [vmem:[%s295_s15] sm:$0xf] %vm439_vm3, %v438_v34 }
 0x22e   : > { %636 = shalt.err (!%p633_p3)
}
 0x22f   : > { %s637_s23 = scalar_lea.hbm %s821_s19, 64  ;;  %s641_s9 = scalar_lea.hbm %s870_s7, 128 }
 0x230   : > { %p638_p4 = scmp.ne.s32.totalorder %s821_s19, %s637_s23  ;;  %p642_p9 = scmp.lt.u32.totalorder %s821_s19, %s870_s7 }
 0x231   : > { %p643_p10 = scmp.lt.u32.totalorder %s641_s9, %s637_s23  ;;  %p645_p12 = scmp.lt.u32.totalorder %s637_s23, %s821_s19 }
 0x232   : > { %p639_p7 = pnand %p638_p4, %p770_p5 }
 0x233   : > { %p644_p11 = por %p643_p10, %p642_p9 }
 0x234   : > { %p640_p8 = pneg %p639_p7 }
 0x235   : > { %p646_p13 = por %p645_p12, %p644_p11 }
 0x237   : > { %p647_p0 = pnand %p646_p13, %p640_p8 }
 0x239   : > { %650 = shalt.err (!%p647_p0)
}
 0x23a   : > { %576 = dma.vmem_to_hbm [thread:$0]  (%p770_p5), %s823_s16, 64, %s821_s19, %s442_s13  }
 0x23b PF: > { %p582_p1 = scmp.ge.s32.totalorder %s685_s27, 2  ;;  %s467_s17 = sand.u32 1, %s673_s24  }
 0x23c   : > { %s468_s18 = scalar_lea.sflag [#allocation3], %s467_s17 }
 0x23d   : > { %p579_p2 = pnand %p582_p1, %p774_p6 }
 0x23f   : > { %668 = dma.done.wait (!%p579_p2), %s468_s18, 64  }
 0x240   : > { %670 = vsyncadd (!%p579_p2), %s468_s18, 4294967232  ;;  %p17_p3 = scmp.ge.s32.totalorder %s757_s30, 4   ;;  %s873_s24 = smov %s677_s25 }
 0x241   : > { %s874_s25 = smov %s681_s26  ;;  %s875_s26 = smov %s768_s10 }
 0x242   : > { %s876_s27 = smov %s757_s30  ;;  %19 = sbr.rel (!%p17_p3) target bundleno = 3 (0x3), region = 89 }
 0x249   :  { %473 = vsyncpa [#allocation3], 1 }
 0x24a   :  { %475 = vsyncpa [#allocation3 + $0x1], 1 }

// kernel: itransformer_forecast.5
= control target key start
LH: loop header
LB: loop body
LE: loop exit
PB: predicated region body
PF: predicated region fallthrough
CT: control target
= control target key end

     0   :  { %s3336_s25 = smov 0   ;;  %s3767_s0 = inlined_call_operand.vmem [shape: f32[2,6,32], index: 0, kind: input, shape index: {}]   ;;  %s3768_s1 = inlined_call_operand.vmem [shape: f32[12,32,8], index: 1, kind: input, shape index: {}]   ;;  %s3769_s2 = inlined_call_operand.vmem [shape: f32[12,1,8], index: 2, kind: input, shape index: {}]   ;;  %s3770_s3 = inlined_call_operand.vmem [shape: f32[4,8,32], index: 3, kind: input, shape index: {}]   ;;  %s3771_s4 = inlined_call_operand.vmem [shape: f32[1,32], index: 4, kind: input, shape index: {}]   ;;  %s3772_s5 = inlined_call_operand.vmem [shape: f32[1,32], index: 5, kind: input, shape index: {}]   ;;  %s3773_s6 = inlined_call_operand.vmem [shape: f32[1,32], index: 6, kind: input, shape index: {}]   ;;  %s3774_s7 = inlined_call_operand.vmem [shape: f32[32,64], index: 7, kind: input, shape index: {}]   ;;  %s3775_s8 = inlined_call_operand.vmem [shape: f32[1,64], index: 8, kind: input, shape index: {}]   ;;  %s3776_s9 = inlined_call_operand.vmem [shape: f32[64,32], index: 9, kind: input, shape index: {}]   ;;  %s3777_s10 = inlined_call_operand.vmem [shape: f32[1,32], index: 10, kind: input, shape index: {}]   ;;  %s3778_s11 = inlined_call_operand.vmem [shape: f32[1,32], index: 11, kind: input, shape index: {}]   ;;  %s3779_s12 = inlined_call_operand.vmem [shape: f32[1,32], index: 12, kind: input, shape index: {}]   ;;  %s3780_s13 = inlined_call_operand.vmem [shape: f32[2,6,32], index: 13, kind: output, shape index: {}]  }
   0x1 LB: > { %s2694_s26 = sadd.s32 4294967295, %s3261_s25   ;;  %p2698_p0 = scmp.ge.s32.totalorder %s3261_s25, 1  ;;  %s3261_s25 = sphi %s3336_s25, %s23_s25  }
   0x2   : > { %p386_p1 = scmp.lt.s32.totalorder %s3261_s25, 3 }
   0x4   : > { %p387_p2 = pnand %p2698_p0, %p386_p1 }
   0x5   : > { %v2703_v0 = vld [vmem:[%s3768_s1 + $0x80] sm:$0xff] (!%p387_p2)  ;;  %v2704_v1 = vld [vmem:[%s3768_s1 + $0x88] sm:$0xff] (!%p387_p2)  ;;  %v3263_v3 = vmov (!%p387_p2), 0.0|0.0   ;;  %v2705_v6 = vld [vmem:[%s3768_s1 + $0x90] sm:$0xff] (!%p387_p2)  ;;  %p428_p3 = scmp.lt.s32.totalorder (!%p387_p2), %s2694_s26, 1  ;;  %vm3264_vm0 = vmmov (!%p387_p2), 0  }
   0x6   : > { %390 = sbr.rel (%p387_p2) target bundleno = 4931 (0x1343), region = 72  ;;  %v437_v2 = vld [vmem:[%s3768_s1] sm:$0xff] (!%p387_p2)  ;;  %3140 = vmatprep.subr.bf16.mxu1 (!%p387_p2), %v3263_v3  ;;  %v3141_v4 = vpack.c.bf16 (!%p387_p2), %v2704_v1, %v2703_v0  ;;  %3134 = vmatprep.subr.bf16.mxu0 (!%p387_p2), %v3263_v3  ;;  %v438_v5 = vld [vmem:[%s3768_s1 + $0x8] sm:$0xff] (!%p387_p2)  ;;  %v2706_v7 = vld [vmem:[%s3768_s1 + $0x98] sm:$0xff] (!%p387_p2)  ;;  %v3265_v11 = vmov (!%p387_p2), 0.0   ;;  %vm448_vm1 = vcmask (!%p387_p2), 261120  }
   0x7   : > { %v3135_v8 = vpack.c.bf16 (!%p387_p2), %v438_v5, %v437_v2  ;;  %v439_v9 = vld [vmem:[%s3768_s1 + $0x10] sm:$0xff] (!%p387_p2)  ;;  %v440_v10 = vld [vmem:[%s3768_s1 + $0x18] sm:$0xff] (!%p387_p2)  ;;  %2931 = vmatprep.mubr.msk.f32.mxu1 (!%p387_p2), %vm3264_vm0, %v3265_v11  ;;  %2920 = vmatprep.mubr.msk.f32.mxu0 (!%p387_p2), %vm3264_vm0, %v3265_v11  ;;  %v3144_v12 = vpack.c.bf16 (!%p387_p2), %v2706_v7, %v2705_v6  ;;  %v2710_v14 = vld [vmem:[%s3768_s1 + $0x100] sm:$0xff] (!%p387_p2)  ;;  %vm688_vm2 = vcmask (!%p387_p2), 64512   ;;  %vm782_vm3 = vcmask (!%p387_p2), 1045504  }
   0x8   : > { %3142 = vmatpush3.bf16.msra.mxu1 (!%p387_p2), %v3141_v4  ;;  %v3138_v13 = vpack.c.bf16 (!%p387_p2), %v440_v10, %v439_v9  ;;  %v2711_v15 = vld [vmem:[%s3768_s1 + $0x108] sm:$0xff] (!%p387_p2)  ;;  %v2712_v18 = vld [vmem:[%s3768_s1 + $0x110] sm:$0xff] (!%p387_p2)  ;;  %v2713_v19 = vld [vmem:[%s3768_s1 + $0x118] sm:$0xff] (!%p387_p2)  ;;  %vm766_vm4 = vcmask (!%p387_p2), 46080   ;;  %vm778_vm5 = vcmask (!%p387_p2), 48128   ;;  %vm2405_vm6 = vcmask (!%p387_p2), 259072  }
   0x9   : > { %3136 = vmatpush3.bf16.msra.mxu0 (!%p387_p2), %v3135_v8  ;;  %3143 = vmatprep.subr.bf16.mxu1 (!%p387_p2), %v3263_v3  ;;  %v3147_v17 = vpack.c.bf16 (!%p387_p2), %v2711_v15, %v2710_v14  ;;  %v3150_v20 = vpack.c.bf16 (!%p387_p2), %v2713_v19, %v2712_v18  ;;  %v2708_v21 = vld [vmem:[%s3769_s2 + $0x4] ss:$0 sm:$0xff] (!%p387_p2)  ;;  %v2701_v22 = vld [vmem:[%s3769_s2] ss:$0 sm:$0xff] (!%p387_p2)  ;;  %v2715_v29 = vld [vmem:[%s3769_s2 + $0x8] ss:$0 sm:$0xff] (!%p387_p2) }
   0xa   : > { %3137 = vmatprep.subr.bf16.mxu0 (!%p387_p2), %v3263_v3  ;;  %v2721_v42 = vld [vmem:[%s3768_s1 + $0x20] sm:$0xff] (!%p387_p2)  ;;  %v2722_v43 = vld [vmem:[%s3768_s1 + $0x28] sm:$0xff] (!%p387_p2)  ;;  %v2723_v45 = vld [vmem:[%s3768_s1 + $0x30] sm:$0xff] (!%p387_p2)  ;;  %vm2536_vm7 = vcmask (!%p387_p2), 523264  }
   0xb   : > { %v3153_v44 = vpack.c.bf16 (!%p387_p2), %v2722_v43, %v2721_v42  ;;  %v2724_v46 = vld [vmem:[%s3768_s1 + $0x38] sm:$0xff] (!%p387_p2)  ;;  %v2728_v49 = vld [vmem:[%s3768_s1 + $0xa0] sm:$0xff] (!%p387_p2)  ;;  %v2729_v50 = vld [vmem:[%s3768_s1 + $0xa8] sm:$0xff] (!%p387_p2) }
   0xc   : > { %3145 = vmatpush3.bf16.msra.mxu1 (!%p387_p2), %v3144_v12  ;;  %v3156_v47 = vpack.c.bf16 (!%p387_p2), %v2724_v46, %v2723_v45  ;;  %v3159_v52 = vpack.c.bf16 (!%p387_p2), %v2729_v50, %v2728_v49  ;;  %v2730_v54 = vld [vmem:[%s3768_s1 + $0xb0] sm:$0xff] (!%p387_p2)  ;;  %v2731_v55 = vld [vmem:[%s3768_s1 + $0xb8] sm:$0xff] (!%p387_p2)  ;;  %v2733_v61 = vld [vmem:[%s3769_s2 + $0x5] ss:$0 sm:$0xff] (!%p387_p2) }
   0xd   : > { %s3782_s26 = smov (!%p428_p3, %s2694_s26), 1  ;;  %3139 = vmatpush3.bf16.msra.mxu0 %v3138_v13  ;;  %2950 = vmatprep.subr.mxu1 %v3265_v11  ;;  %v3162_v56 = vpack.c.bf16 %v2731_v55, %v2730_v54  ;;  %v2726_v62 = vld [vmem:[%s3769_s2 + $0x1] ss:$0 sm:$0xff]  ;;  %v2736_v5 = vld [vmem:[%s3768_s1 + $0x128] sm:$0xff]  ;;  %v2737_v6 = vld [vmem:[%s3768_s1 + $0x130] sm:$0xff] }
   0xe   : > { %s2699_s28 = sshll.u32 %s3782_s26, 3  ;;  %3146 = vmatprep.subr.bf16.mxu0 %v3263_v3  ;;  %v2735_v4 = vld [vmem:[%s3768_s1 + $0x120] sm:$0xff]  ;;  %v2738_v8 = vld [vmem:[%s3768_s1 + $0x138] sm:$0xff] }
   0xf   : > { %s431_s18 = scalar_lea.vmem %s3767_s0, %s2699_s28  ;;  %v3165_v7 = vpack.c.bf16 %v2736_v5, %v2735_v4  ;;  %v3168_v9 = vpack.c.bf16 %v2738_v8, %v2737_v6  ;;  %v2761_v46 = vld [vmem:[%s3769_s2 + $0x6] ss:$0 sm:$0xff]  ;;  %s435_s30 = scalar_lea.vmem %s3780_s13, %s2699_s28 }
  0x10   : > { %v3390_v16 = vld [vmem:[%s431_s18] sm:$0x3f] }
  0x11   : > { %2932 = vmatmul.mubr.msk.f32.vlgmr.msra.gmra.mrb[0].mxu1 %vm448_vm1, %v3390_v16  ;;  %2921 = vmatmul.mubr.msk.f32.vlgmr.msra.gmra.mrb[0].mxu0 %vm448_vm1, %v3390_v16 }
  0x12   : > { %2952 = vmatprep.mubr.msk.f32.mxu1 %vm3264_vm0, %v3265_v11  ;;  %3148 = vmatpush3.bf16.msra.mxu0 %v3147_v17 }
  0x13   : > { %2942 = vmatprep.mubr.msk.f32.mxu0 %vm3264_vm0, %v3265_v11  ;;  %3149 = vmatprep.subr.bf16.mxu0 %v3263_v3 }
  0x16   : > { %3151 = vmatpush3.bf16.msra.mxu0 %v3150_v20 }
  0x17   : > { %2945 = vmatprep.subr.mxu0 %v3265_v11 }
  0x19   : > { %2943 = vmatmul.mubr.msk.f32.vlgmr.msra.gmra.mrb[2].mxu0 %vm448_vm1, %v3390_v16 }
  0x1a   : > { %2947 = vmatprep.mubr.msk.f32.mxu0 %vm3264_vm0, %v3265_v11 }
  0xe4   : > { %v601_v23 = vpop.f32.mrb[0].mxu1  ;;  %v518_v26 = vpop.f32.mrb[0].mxu0 }
  0xe5   : > { %v602_v24 = vadd.f32 %v2708_v21, %v601_v23  ;;  %v2933_v25 = vpop.f32.mrb[1].mxu1  ;;  %v519_v27 = vadd.f32 %v2701_v22, %v518_v26  ;;  %v2922_v28 = vpop.f32.mrb[1].mxu0  ;;  %v2740_v22 = vld [vmem:[%s3769_s2 + $0x9] ss:$0 sm:$0xff] }
  0xe6   : > { %v2746_v25 = vld [vmem:[%s3770_s3 + $0x8] sm:$0xff] }
  0xe7   : > { %2946 = vmatpush3.xpose.msk.msra.mxu0 %vm688_vm2, %v602_v24 }
  0xe8   : > { %3152 = vmatprep.subr.bf16.mxu0 %v3263_v3 }
  0xea   : > { %2948 = vmatmul.mubr.msk.f32.vlgmr.msra.gmra.mrb[4].mxu0 %vm688_vm2, %v519_v27 }
  0xeb   : > { %2963 = vmatprep.mubr.msk.f32.mxu0 %vm3264_vm0, %v3265_v11  ;;  %3154 = vmatpush3.bf16.msra.mxu0 %v3153_v44 }
  0xec   : > { %v684_v30 = vpop.f32.mrb[2].mxu0  ;;  %3155 = vmatprep.subr.bf16.mxu0 %v3263_v3 }
  0xed   : > { %v685_v31 = vadd.f32 %v2715_v29, %v684_v30  ;;  %v2944_v32 = vpop.f32.mrb[3].mxu0  ;;  %v856_v29 = vld [vmem:[%s3770_s3] sm:$0xff] }
  0xee   : > { %v2756_v30 = vld [vmem:[%s3768_s1 + $0xc0] sm:$0xff] }
  0xef   : > { %2951 = vmatpush3.msk.msra.mxu1 %vm782_vm3, %v685_v31  ;;  %3157 = vmatpush3.bf16.msra.mxu0 %v3156_v47  ;;  %v2757_v31 = vld [vmem:[%s3768_s1 + $0xc8] sm:$0xff] }
  0xf0   : > { %3158 = vmatprep.subr.bf16.mxu1 %v3263_v3  ;;  %3164 = vmatprep.subr.bf16.mxu0 %v3263_v3  ;;  %v3177_v32 = vpack.c.bf16 %v2757_v31, %v2756_v30 }
  0xf2   : > { %2964 = vmatmul.mubr.msk.f32.vlgmr.msra.gmra.mrb[6].mxu0 %vm448_vm1, %v3390_v16 }
  0xf3   : > { %2985 = vmatprep.mubr.msk.f32.mxu0 %vm3264_vm0, %v3265_v11  ;;  %3166 = vmatpush3.bf16.msra.mxu0 %v3165_v7 }
  0xf4   : > { %3167 = vmatprep.subr.bf16.mxu0 %v3263_v3 }
  0xf7   : > { %3169 = vmatpush3.bf16.msra.mxu0 %v3168_v9 }
  0xf8   : > { %2998 = vmatprep.subr.mxu0 %v3265_v11 }
  0xfa   : > { %2986 = vmatmul.mubr.msk.f32.vlgmr.msra.gmra.mrb[8].mxu0 %vm448_vm1, %v3390_v16 }
  0xfb   : > { %3000 = vmatprep.mubr.msk.f32.mxu0 %vm3264_vm0, %v3265_v11  ;;  %2999 = vmatpush3.msra.mxu0 %v2746_v25  ;;  %v2783_v25 = vld [vmem:[%s3768_s1 + $0xe0] sm:$0xff] }
  0xfc   : > { %3170 = vmatprep.subr.bf16.mxu0 %v3263_v3 }
 0x1bd   : > { %v761_v33 = vpop.f32.mrb[4].mxu0 }
 0x1be   : > { %v765_v34 = vmul.f32 0.35355338, %v761_v33  ;;  %v2949_v35 = vpop.f32.mrb[5].mxu0  ;;  %v2758_v33 = vld [vmem:[%s3768_s1 + $0xd0] sm:$0xff] }
 0x1c0   : > { %v767_v36 = vsel %vm766_vm4, %v765_v34, -inf }
 0x1c1   : > { %768 = vmax.xlane.f32.xlu0 %v767_v36  ;;  %v2749_v36 = vld [vmem:[%s3768_s1 + $0x40] sm:$0xff] }
 0x1c5   : > { %v936_v57 = vpop.f32.mrb[6].mxu0 }
 0x1c6   : > { %v2965_v58 = vpop.f32.mrb[7].mxu0  ;;  %v937_v2 = vadd.f32 %v2726_v62, %v936_v57  ;;  %v2763_v57 = vld [vmem:[%s3768_s1 + $0x140] sm:$0xff] }
 0x1c7   : > { %v2764_v58 = vld [vmem:[%s3768_s1 + $0x148] sm:$0xff] }
 0x1cd   : > { %v1102_v21 = vpop.f32.mrb[8].mxu0 }
 0x1ce   : > { %v2987_v23 = vpop.f32.mrb[9].mxu0  ;;  %v1103_v24 = vadd.f32 %v2740_v22, %v1102_v21  ;;  %v2778_v22 = vld [vmem:[%s3768_s1 + $0x70] sm:$0xff] }
 0x1cf   : > { %v2779_v23 = vld [vmem:[%s3768_s1 + $0x78] sm:$0xff] }
 0x24e   : > { %v769_v37 = vpop.xlane.xlu0 %768 }
 0x24f   : > { %v770_v38 = vsub.f32 %v765_v34, %v769_v37  ;;  %v2759_v34 = vld [vmem:[%s3768_s1 + $0xd8] sm:$0xff]  ;;  %v2750_v37 = vld [vmem:[%s3768_s1 + $0x48] sm:$0xff] }
 0x250   : > { %v3180_v35 = vpack.c.bf16 %v2759_v34, %v2758_v33 }
 0x251   : > { %v771_v39 = vmul.f32 1.442695, %v770_v38  ;;  %v3171_v38 = vpack.c.bf16 %v2750_v37, %v2749_v36 }
 0x253   : > { %3235 = vpow2.f32 %v771_v39  ;;  %v2751_v39 = vld [vmem:[%s3768_s1 + $0x50] sm:$0xff] }
 0x25d   : > { %v3236_v40 = vpop.eup %3235 }
 0x25e   : > { %v773_v41 = vsel %vm766_vm4, %v3236_v40, 0.0 }
 0x25f   : > { %774 = vadd.xlane.f32.xlu0 %v773_v41 }
 0x2ec   : > { %v775_v48 = vpop.xlane.xlu0 %774 }
 0x2ed   : > { %3237 = vrcp.f32 %v775_v48 }
 0x2f7   : > { %v3238_v51 = vpop.eup %3237 }
 0x2f8   : > { %v777_v53 = vmul.f32 %v3238_v51, %v3236_v40  ;;  %v2752_v40 = vld [vmem:[%s3768_s1 + $0x58] sm:$0xff] }
 0x2f9   : > { %v3174_v43 = vpack.c.bf16 %v2752_v40, %v2751_v39  ;;  %v2781_v39 = vld [vmem:[%s3769_s2 + $0x3] ss:$0 sm:$0xff] }
 0x2fa   : > { %2953 = vmatmul.mubr.msk.f32.vlgmr.msra.gmra.mrb[2].mxu1 %vm778_vm5, %v777_v53  ;;  %v2754_v53 = vld [vmem:[%s3769_s2 + $0x2] ss:$0 sm:$0xff] }
 0x2fb   : > { %3160 = vmatpush3.bf16.msra.mxu1 %v3159_v52  ;;  %2974 = vmatprep.mubr.msk.f32.mxu1 %vm3264_vm0, %v3265_v11 }
 0x2fc   : > { %3161 = vmatprep.subr.bf16.mxu1 %v3263_v3 }
 0x2ff   : > { %3163 = vmatpush3.bf16.msra.mxu1 %v3162_v56 }
 0x300   : > { %2988 = vmatprep.subr.mxu1 %v3265_v11 }
 0x302   : > { %2975 = vmatmul.mubr.msk.f32.vlgmr.msra.gmra.mrb[4].mxu1 %vm448_vm1, %v3390_v16 }
 0x303   : > { %2990 = vmatprep.mubr.msk.f32.mxu1 %vm3264_vm0, %v3265_v11 }
 0x3cd   : > { %v852_v59 = vpop.f32.mrb[2].mxu1 }
 0x3ce   : > { %v2954_v60 = vpop.f32.mrb[3].mxu1 }
 0x3cf   : > { %v3183_v60 = vpack.c.bf16 %v2764_v58, %v2763_v57 }
 0x3d5   : > { %v1019_v63 = vpop.f32.mrb[4].mxu1 }
 0x3d6   : > { %v1020_v0 = vadd.f32 %v2733_v61, %v1019_v63  ;;  %v2976_v1 = vpop.f32.mrb[5].mxu1  ;;  %v2766_v61 = vld [vmem:[%s3768_s1 + $0x158] sm:$0xff] }
 0x3d8   : > { %2989 = vmatpush3.xpose.msk.msra.mxu1 %vm688_vm2, %v1020_v0 }
 0x3d9   : > { %2993 = vmatprep.subr.mxu1 %v3265_v11 }
 0x3db   : > { %2991 = vmatmul.mubr.msk.f32.vlgmr.msra.gmra.mrb[6].mxu1 %vm688_vm2, %v937_v2 }
 0x3dc   : > { %2995 = vmatprep.mubr.msk.f32.mxu1 %vm3264_vm0, %v3265_v11  ;;  %2994 = vmatpush3.msk.msra.mxu1 %vm782_vm3, %v1103_v24  ;;  %v3192_v24 = vpack.c.bf16 %v2779_v23, %v2778_v22  ;;  %v2439_v22 = vld [vmem:[%s3774_s7 + $0x18] sm:$0xff] }
 0x3dd   : > { %3003 = vmatprep.subr.mxu1 %v3265_v11 }
 0x4ae   : > { %v1178_v10 = vpop.f32.mrb[6].mxu1 }
 0x4af   : > { %v1182_v12 = vmul.f32 0.35355338, %v1178_v10  ;;  %v2992_v13 = vpop.f32.mrb[7].mxu1  ;;  %v2768_v10 = vld [vmem:[%s3769_s2 + $0xa] ss:$0 sm:$0xff] }
 0x4b1   : > { %v1183_v14 = vsel %vm766_vm4, %v1182_v12, -inf }
 0x4b2   : > { %1184 = vmax.xlane.f32.xlu1 %v1183_v14  ;;  %v2774_v14 = vld [vmem:[%s3770_s3 + $0x10] sm:$0xff] }
 0x53f   : > { %v1185_v15 = vpop.xlane.xlu1 %1184 }
 0x540   : > { %v1186_v17 = vsub.f32 %v1182_v12, %v1185_v15 }
 0x542   : > { %v1187_v18 = vmul.f32 1.442695, %v1186_v17 }
 0x544   : > { %3239 = vpow2.f32 %v1187_v18 }
 0x54e   : > { %v3240_v19 = vpop.eup %3239 }
 0x54f   : > { %v1189_v20 = vsel %vm766_vm4, %v3240_v19, 0.0 }
 0x550   : > { %1190 = vadd.xlane.f32.xlu1 %v1189_v20  ;;  %v2777_v20 = vld [vmem:[%s3768_s1 + $0x68] sm:$0xff] }
 0x5dd   : > { %v1191_v26 = vpop.xlane.xlu1 %1190 }
 0x5de   : > { %3241 = vrcp.f32 %v1191_v26  ;;  %v2784_v26 = vld [vmem:[%s3768_s1 + $0xe8] sm:$0xff] }
 0x5e8   : > { %v3242_v27 = vpop.eup %3241 }
 0x5e9   : > { %v1193_v28 = vmul.f32 %v3242_v27, %v3240_v19  ;;  %v2776_v19 = vld [vmem:[%s3768_s1 + $0x60] sm:$0xff]  ;;  %v3195_v27 = vpack.c.bf16 %v2784_v26, %v2783_v25  ;;  %v2522_v25 = vld [vmem:[%s3776_s9 + $0x8] sm:$0xff]  ;;  %v2523_v26 = vld [vmem:[%s3776_s9 + $0x10] sm:$0xff] }
 0x5ea   : > { %v3189_v21 = vpack.c.bf16 %v2777_v20, %v2776_v19  ;;  %v2436_v19 = vld [vmem:[%s3774_s7] sm:$0xff]  ;;  %v2437_v20 = vld [vmem:[%s3774_s7 + $0x8] sm:$0xff] }
 0x5eb   : > { %2996 = vmatmul.mubr.msk.f32.vlgmr.msra.gmra.mrb[8].mxu1 %vm778_vm5, %v1193_v28  ;;  %v2785_v28 = vld [vmem:[%s3768_s1 + $0xf0] sm:$0xff] }
 0x5ec   : > { %3004 = vmatpush3.msra.mxu1 %v856_v29  ;;  %3005 = vmatprep.mubr.msk.f32.mxu1 %vm3264_vm0, %v3265_v11  ;;  %v2786_v29 = vld [vmem:[%s3768_s1 + $0xf8] sm:$0xff] }
 0x5ed   : > { %3176 = vmatprep.subr.bf16.mxu1 %v3263_v3 }
 0x5ef   : > { %3006 = vmatmul.mubr.msk.f32.vlgmr.msra.gmra.mrb[10].mxu1 %vm688_vm2, %v852_v59  ;;  %v2765_v59 = vld [vmem:[%s3768_s1 + $0x150] sm:$0xff] }
 0x5f0   : > { %3178 = vmatpush3.bf16.msra.mxu1 %v3177_v32  ;;  %3027 = vmatprep.mubr.msk.f32.mxu1 %vm3264_vm0, %v3265_v11  ;;  %v3186_v62 = vpack.c.bf16 %v2766_v61, %v2765_v59  ;;  %v3198_v32 = vpack.c.bf16 %v2786_v29, %v2785_v28  ;;  %v2524_v28 = vld [vmem:[%s3776_s9 + $0x18] sm:$0xff] }
 0x5f1   : > { %3179 = vmatprep.subr.bf16.mxu1 %v3263_v3  ;;  %v3216_v29 = vpack.c.bf16 %v2524_v28, %v2523_v26 }
 0x5f4   : > { %3181 = vmatpush3.bf16.msra.mxu1 %v3180_v35 }
 0x5f5   : > { %3041 = vmatprep.subr.mxu1 %v3265_v11 }
 0x5f7   : > { %3028 = vmatmul.mubr.msk.f32.vlgmr.msra.gmra.mrb[12].mxu1 %vm448_vm1, %v3390_v16 }
 0x5f8   : > { %3043 = vmatprep.mubr.msk.f32.mxu1 %vm3264_vm0, %v3265_v11 }
 0x6be   : > { %v1266_v41 = vpop.f32.mrb[8].mxu1 }
 0x6bf   : > { %v2997_v42 = vpop.f32.mrb[9].mxu1  ;;  %3001 = vmatmul.mubr.msk.f32.vlgmr.msra.gmra.mrb[10].mxu0 %vm688_vm2, %v1266_v41 }
 0x6c0   : > { %3172 = vmatpush3.bf16.msra.mxu0 %v3171_v38  ;;  %3016 = vmatprep.mubr.msk.f32.mxu0 %vm3264_vm0, %v3265_v11  ;;  %v2788_v38 = vld [vmem:[%s3769_s2 + $0x7] ss:$0 sm:$0xff] }
 0x6c1   : > { %3173 = vmatprep.subr.bf16.mxu0 %v3263_v3 }
 0x6c2   : > { %v1414_v44 = vpop.f32.mrb[10].mxu1 }
 0x6c3   : > { %v3007_v45 = vpop.f32.mrb[11].mxu1 }
 0x6c4   : > { %3175 = vmatpush3.bf16.msra.mxu0 %v3174_v43  ;;  %v2791_v45 = vld [vmem:[%s3768_s1 + $0x168] sm:$0xff] }
 0x6c5   : > { %3182 = vmatprep.subr.bf16.mxu0 %v3263_v3 }
 0x6c7   : > { %3017 = vmatmul.mubr.msk.f32.vlgmr.msra.gmra.mrb[12].mxu0 %vm448_vm1, %v3390_v16 }
 0x6c8   : > { %3038 = vmatprep.mubr.msk.f32.mxu0 %vm3264_vm0, %v3265_v11  ;;  %3184 = vmatpush3.bf16.msra.mxu0 %v3183_v60  ;;  %v2795_v60 = vld [vmem:[%s3769_s2 + $0xb] ss:$0 sm:$0xff] }
 0x6c9   : > { %3185 = vmatprep.subr.bf16.mxu0 %v3263_v3 }
 0x6ca   : > { %v1580_v47 = vpop.f32.mrb[12].mxu1 }
 0x6cb   : > { %v1581_v48 = vadd.f32 %v2761_v46, %v1580_v47  ;;  %v3029_v49 = vpop.f32.mrb[13].mxu1  ;;  %v2792_v46 = vld [vmem:[%s3768_s1 + $0x170] sm:$0xff] }
 0x6cc   : > { %3187 = vmatpush3.bf16.msra.mxu0 %v3186_v62 }
 0x6cd   : > { %3042 = vmatpush3.xpose.msk.msra.mxu1 %vm688_vm2, %v1581_v48  ;;  %3051 = vmatprep.subr.mxu0 %v3265_v11  ;;  %v2793_v48 = vld [vmem:[%s3768_s1 + $0x178] sm:$0xff] }
 0x6ce   : > { %3046 = vmatprep.subr.mxu1 %v3265_v11  ;;  %v3204_v49 = vpack.c.bf16 %v2793_v48, %v2792_v46 }
 0x6cf   : > { %3039 = vmatmul.mubr.msk.f32.vlgmr.msra.gmra.mrb[14].mxu0 %vm448_vm1, %v3390_v16 }
 0x6d0   : > { %3053 = vmatprep.mubr.msk.f32.mxu0 %vm3264_vm0, %v3265_v11  ;;  %3052 = vmatpush3.msra.mxu0 %v2774_v14 }
 0x6d1   : > { %3194 = vmatprep.subr.bf16.mxu0 %v3263_v3 }
 0x792   : > { %v1341_v50 = vpop.f32.mrb[10].mxu0 }
 0x793   : > { %v3565_v51 = vadd.f32 %v1414_v44, %v1341_v50  ;;  %v3002_v52 = vpop.f32.mrb[11].mxu0  ;;  %v2790_v44 = vld [vmem:[%s3768_s1 + $0x160] sm:$0xff] }
 0x794   : > { %v3201_v47 = vpack.c.bf16 %v2791_v45, %v2790_v44  ;;  %v2806_v44 = vld [vmem:[%s3775_s8] ss:$0 sm:$0xff] }
 0x79a   : > { %v1497_v54 = vpop.f32.mrb[12].mxu0 }
 0x79b   : > { %v1498_v55 = vadd.f32 %v2754_v53, %v1497_v54  ;;  %v3018_v56 = vpop.f32.mrb[13].mxu0 }
 0x79d   : > { %3044 = vmatmul.mubr.msk.f32.vlgmr.msra.gmra.mrb[14].mxu1 %vm688_vm2, %v1498_v55 }
 0x79e   : > { %3048 = vmatprep.mubr.msk.f32.mxu1 %vm3264_vm0, %v3265_v11 }
 0x7a2   : > { %v1663_v9 = vpop.f32.mrb[14].mxu0 }
 0x7a3   : > { %v3040_v12 = vpop.f32.mrb[15].mxu0  ;;  %v1664_v13 = vadd.f32 %v2768_v10, %v1663_v9 }
 0x7a5   : > { %3047 = vmatpush3.msk.msra.mxu1 %vm782_vm3, %v1664_v13 }
 0x7a6   : > { %3188 = vmatprep.subr.bf16.mxu1 %v3263_v3 }
 0x870   : > { %v1739_v63 = vpop.f32.mrb[14].mxu1 }
 0x871   : > { %v1743_v0 = vmul.f32 0.35355338, %v1739_v63  ;;  %v3045_v1 = vpop.f32.mrb[15].mxu1  ;;  %v2801_v63 = vld [vmem:[%s3770_s3 + $0x18] sm:$0xff] }
 0x873   : > { %v1744_v2 = vsel %vm766_vm4, %v1743_v0, -inf }
 0x874   : > { %1745 = vmax.xlane.f32.xlu0 %v1744_v2 }
 0x901   : > { %v1746_v4 = vpop.xlane.xlu0 %1745 }
 0x902   : > { %v1747_v5 = vsub.f32 %v1743_v0, %v1746_v4 }
 0x904   : > { %v1748_v6 = vmul.f32 1.442695, %v1747_v5 }
 0x906   : > { %3243 = vpow2.f32 %v1748_v6 }
 0x910   : > { %v3244_v7 = vpop.eup %3243 }
 0x911   : > { %v1750_v8 = vsel %vm766_vm4, %v3244_v7, 0.0 }
 0x912   : > { %1751 = vadd.xlane.f32.xlu1 %v1750_v8 }
 0x99f   : > { %v1752_v15 = vpop.xlane.xlu1 %1751 }
 0x9a0   : > { %3245 = vrcp.f32 %v1752_v15 }
 0x9aa   : > { %v3246_v17 = vpop.eup %3245 }
 0x9ab   : > { %v1754_v18 = vmul.f32 %v3246_v17, %v3244_v7  ;;  %v2803_v7 = vld [vmem:[%s3771_s4] ss:$0 sm:$0xff] }
 0x9ad   : > { %3049 = vmatmul.mubr.msk.f32.vlgmr.msra.gmra.mrb[16].mxu1 %vm778_vm5, %v1754_v18 }
 0x9ae   : > { %3064 = vmatprep.mubr.msk.f32.mxu1 %vm3264_vm0, %v3265_v11  ;;  %3190 = vmatpush3.bf16.msra.mxu1 %v3189_v21  ;;  %v3207_v21 = vpack.c.bf16 %v2437_v20, %v2436_v19 }
 0x9af   : > { %3191 = vmatprep.subr.bf16.mxu1 %v3263_v3 }
 0x9b2   : > { %3193 = vmatpush3.bf16.msra.mxu1 %v3192_v24  ;;  %v2521_v24 = vld [vmem:[%s3776_s9] sm:$0xff] }
 0x9b3   : > { %3200 = vmatprep.subr.bf16.mxu1 %v3263_v3 }
 0x9b5   : > { %3065 = vmatmul.mubr.msk.f32.vlgmr.msra.gmra.mrb[18].mxu1 %vm448_vm1, %v3390_v16 }
 0x9b6   : > { %3086 = vmatprep.mubr.msk.f32.mxu1 %vm3264_vm0, %v3265_v11  ;;  %3202 = vmatpush3.bf16.msra.mxu1 %v3201_v47 }
 0x9b7   : > { %3203 = vmatprep.subr.bf16.mxu1 %v3263_v3 }
 0x9ba   : > { %3205 = vmatpush3.bf16.msra.mxu1 %v3204_v49  ;;  %v2808_v49 = vld [vmem:[%s3777_s10] ss:$0 sm:$0xff] }
 0x9bb   : > { %3099 = vmatprep.subr.mxu1 %v3265_v11 }
 0x9bd   : > { %3087 = vmatmul.mubr.msk.f32.vlgmr.msra.gmra.mrb[20].mxu1 %vm448_vm1, %v3390_v16 }
 0x9be   : > { %3101 = vmatprep.mubr.msk.f32.mxu1 %vm3264_vm0, %v3265_v11  ;;  %3100 = vmatpush3.msra.mxu1 %v2801_v63 }
 0x9bf   : > { %3212 = vmatprep.subr.bf16.mxu1 %v3263_v3 }
 0xa80   : > { %v1827_v30 = vpop.f32.mrb[16].mxu1 }
 0xa81   : > { %v3050_v31 = vpop.f32.mrb[17].mxu1  ;;  %3054 = vmatmul.mubr.msk.f32.vlgmr.msra.gmra.mrb[16].mxu0 %vm688_vm2, %v1827_v30  ;;  %v2525_v30 = vld [vmem:[%s3776_s9 + $0x20] sm:$0xff] }
 0xa82   : > { %3196 = vmatpush3.bf16.msra.mxu0 %v3195_v27  ;;  %3075 = vmatprep.mubr.msk.f32.mxu0 %vm3264_vm0, %v3265_v11  ;;  %v3213_v27 = vpack.c.bf16 %v2522_v25, %v2521_v24  ;;  %v2526_v31 = vld [vmem:[%s3776_s9 + $0x28] sm:$0xff] }
 0xa83   : > { %3197 = vmatprep.subr.bf16.mxu0 %v3263_v3 }
 0xa86   : > { %3199 = vmatpush3.bf16.msra.mxu0 %v3198_v32  ;;  %v3219_v32 = vpack.c.bf16 %v2526_v31, %v2525_v30 }
 0xa87   : > { %3089 = vmatprep.subr.mxu0 %v3265_v11 }
 0xa88   : > { %v1986_v33 = vpop.f32.mrb[18].mxu1 }
 0xa89   : > { %3076 = vmatmul.mubr.msk.f32.vlgmr.msra.gmra.mrb[18].mxu0 %vm448_vm1, %v3390_v16  ;;  %v3066_v34 = vpop.f32.mrb[19].mxu1  ;;  %v1987_v43 = vadd.f32 %v2781_v39, %v1986_v33  ;;  %v2805_v39 = vld [vmem:[%s3773_s6] ss:$0 sm:$0xff] }
 0xa8a   : > { %3091 = vmatprep.mubr.msk.f32.mxu0 %vm3264_vm0, %v3265_v11 }
 0xa90   : > { %v2152_v59 = vpop.f32.mrb[20].mxu1 }
 0xa91   : > { %v3088_v61 = vpop.f32.mrb[21].mxu1  ;;  %v2153_v62 = vadd.f32 %v2795_v60, %v2152_v59 }
 0xb54   : > { %v1902_v35 = vpop.f32.mrb[16].mxu0 }
 0xb55   : > { %v1906_v36 = vadd.f32 %v1902_v35, %v3565_v51  ;;  %v3055_v37 = vpop.f32.mrb[17].mxu0 }
 0xb56   : > { %v2804_v37 = vld [vmem:[%s3772_s5] ss:$0 sm:$0xff] }
 0xb5c   : > { %v2069_v40 = vpop.f32.mrb[18].mxu0 }
 0xb5d   : > { %v2070_v41 = vadd.f32 %v2788_v38, %v2069_v40  ;;  %v3077_v42 = vpop.f32.mrb[19].mxu0 }
 0xb5e   : > { %v2528_v42 = vld [vmem:[%s3776_s9 + $0x38] sm:$0xff] }
 0xb5f   : > { %3090 = vmatpush3.xpose.msk.msra.mxu0 %vm688_vm2, %v2070_v41 }
 0xb60   : > { %3094 = vmatprep.subr.mxu0 %v3265_v11 }
 0xb62   : > { %3092 = vmatmul.mubr.msk.f32.vlgmr.msra.gmra.mrb[20].mxu0 %vm688_vm2, %v1987_v43 }
 0xb63   : > { %3096 = vmatprep.mubr.msk.f32.mxu0 %vm3264_vm0, %v3265_v11  ;;  %3095 = vmatpush3.msk.msra.mxu0 %vm782_vm3, %v2153_v62 }
 0xb64   : > { %3206 = vmatprep.subr.bf16.mxu0 %v3263_v3 }
 0xc35   : > { %v2228_v50 = vpop.f32.mrb[20].mxu0 }
 0xc36   : > { %v2232_v51 = vmul.f32 0.35355338, %v2228_v50  ;;  %v3093_v52 = vpop.f32.mrb[21].mxu0 }
 0xc38   : > { %v2233_v53 = vsel %vm766_vm4, %v2232_v51, -inf }
 0xc39   : > { %2234 = vmax.xlane.f32.xlu0 %v2233_v53 }
 0xcc6   : > { %v2235_v54 = vpop.xlane.xlu0 %2234 }
 0xcc7   : > { %v2236_v55 = vsub.f32 %v2232_v51, %v2235_v54 }
 0xcc9   : > { %v2237_v56 = vmul.f32 1.442695, %v2236_v55 }
 0xccb   : > { %3247 = vpow2.f32 %v2237_v56 }
 0xcd5   : > { %v3248_v57 = vpop.eup %3247 }
 0xcd6   : > { %v2239_v58 = vsel %vm766_vm4, %v3248_v57, 0.0 }
 0xcd7   : > { %2240 = vadd.xlane.f32.xlu1 %v2239_v58 }
 0xd64   : > { %v2241_v0 = vpop.xlane.xlu1 %2240 }
 0xd65   : > { %3249 = vrcp.f32 %v2241_v0  ;;  %v2810_v0 = vld [vmem:[%s3778_s11] ss:$0 sm:$0xff] }
 0xd6f   : > { %v3250_v1 = vpop.eup %3249 }
 0xd70   : > { %v2243_v2 = vmul.f32 %v3250_v1, %v3248_v57 }
 0xd72   : > { %3097 = vmatmul.mubr.msk.f32.vlgmr.msra.gmra.mrb[22].mxu0 %vm778_vm5, %v2243_v2  ;;  %v2811_v2 = vld [vmem:[%s3779_s12] ss:$0 sm:$0xff] }
 0xd73   : > { %3112 = vmatprep.mubr.msk.f32.mxu0 %vm3264_vm0, %v3265_v11  ;;  %3208 = vmatpush3.bf16.msra.mxu0 %v3207_v21 }
 0xd74   : > { %3209 = vmatprep.subr.bf16.mxu0 %v3263_v3 }
 0xe45   : > { %v2316_v4 = vpop.f32.mrb[22].mxu0 }
 0xe46   : > { %v3098_v5 = vpop.f32.mrb[23].mxu0  ;;  %3102 = vmatmul.mubr.msk.f32.vlgmr.msra.gmra.mrb[22].mxu1 %vm688_vm2, %v2316_v4 }
 0xe47   : > { %3131 = vmatprep.mubr.msk.f32.mxu1 %vm3264_vm0, %v3265_v11  ;;  %3214 = vmatpush3.bf16.msra.mxu1 %v3213_v27 }
 0xe48   : > { %3215 = vmatprep.subr.bf16.mxu1 %v3263_v3 }
 0xe4b   : > { %3217 = vmatpush3.bf16.msra.mxu1 %v3216_v29 }
 0xe4c   : > { %3218 = vmatprep.subr.bf16.mxu1 %v3263_v3 }
 0xe4f   : > { %3220 = vmatpush3.bf16.msra.mxu1 %v3219_v32 }
 0xe50   : > { %3221 = vmatprep.subr.bf16.mxu1 %v3263_v3  ;;  %v2527_v3 = vld [vmem:[%s3776_s9 + $0x30] sm:$0xff] }
 0xe51   : > { %v3222_v43 = vpack.c.bf16 %v2528_v42, %v2527_v3 }
 0xe53   : > { %3223 = vmatpush3.bf16.msra.mxu1 %v3222_v43 }
 0xf19   : > { %v2391_v6 = vpop.f32.mrb[22].mxu1 }
 0xf1a   : > { %v2395_v8 = vadd.f32 %v2391_v6, %v1906_v36  ;;  %v3103_v9 = vpop.f32.mrb[23].mxu1 }
 0xf1c   : > { %v2403_v10 = vadd.f32 %v2803_v7, %v2395_v8 }
 0xf1e   : > { %v2404_v12 = vadd.f32 %v2403_v10, %v3390_v16  ;;  %v2438_v16 = vld [vmem:[%s3774_s7 + $0x10] sm:$0xff] }
 0xf1f   : > { %v3210_v23 = vpack.c.bf16 %v2439_v22, %v2438_v16 }
 0xf20   : > { %v2406_v13 = vsel %vm2405_vm6, %v2404_v12, 0.0 }
 0xf21   : > { %2407 = vadd.xlane.f32.xlu0 %v2406_v13  ;;  %3211 = vmatpush3.bf16.msra.mxu0 %v3210_v23 }
 0xfae   : > { %v2408_v14 = vpop.xlane.xlu0 %2407 }
 0xfaf   : > { %v2410_v15 = vmul.f32 0.03125, %v2408_v14 }
 0xfb1   : > { %v2411_v17 = vsub.f32 %v2404_v12, %v2410_v15 }
 0xfb3   : > { %v2412_v18 = vmul.f32 %v2411_v17, %v2411_v17 }
 0xfb5   : > { %v2413_v11 = vsel %vm2405_vm6, %v2412_v18, 0.0 }
 0xfb6   : > { %2414 = vadd.xlane.f32.xlu1 %v2413_v11 }
0x1043   : > { %v2415_v33 = vpop.xlane.xlu1 %2414 }
0x1044   : > { %v2416_v34 = vmul.f32 0.03125, %v2415_v33 }
0x1046   : > { %v2417_v35 = vadd.f32 1e-05, %v2416_v34 }
0x1048   : > { %3251 = vrsqrt.f32 %v2417_v35 }
0x1052   : > { %v3252_v36 = vpop.eup %3251 }
0x1053   : > { %v2419_v38 = vmul.f32 %v3252_v36, %v2411_v17 }
0x1055   : > { %v2427_v40 = vmul.f32 %v2804_v37, %v2419_v38 }
0x1057   : > { %v2435_v41 = vadd.f32 %v2805_v39, %v2427_v40 }
0x1059   : > { %3113 = vmatmul.mubr.msk.f32.vlgmr.msra.gmra.mrb[24].mxu0 %vm448_vm1, %v2435_v41 }
0x112c   : > { %v2516_v45 = vpop.f32.mrb[24].mxu0 }
0x112d   : > { %v2517_v46 = vadd.f32 %v2806_v44, %v2516_v45  ;;  %v3114_v47 = vpop.f32.mrb[25].mxu0 }
0x112f   : > { %v2520_v48 = vmax.f32 %v2517_v46, 0.0 }
0x1131   : > { %3132 = vmatmul.mubr.msk.f32.vlgmr.msra.gmra.mrb[24].mxu1 %vm2536_vm7, %v2520_v48 }
0x1204   : > { %v2606_v50 = vpop.f32.mrb[24].mxu1 }
0x1205   : > { %v2607_v51 = vadd.f32 %v2808_v49, %v2606_v50  ;;  %v3133_v52 = vpop.f32.mrb[25].mxu1 }
0x1207   : > { %v2610_v53 = vadd.f32 %v2607_v51, %v2435_v41 }
0x1209   : > { %v2611_v54 = vsel %vm2405_vm6, %v2610_v53, 0.0 }
0x120a   : > { %2612 = vadd.xlane.f32.xlu0 %v2611_v54 }
0x1297   : > { %v2613_v55 = vpop.xlane.xlu0 %2612 }
0x1298   : > { %v2614_v56 = vmul.f32 0.03125, %v2613_v55 }
0x129a   : > { %v2615_v57 = vsub.f32 %v2610_v53, %v2614_v56 }
0x129c   : > { %v2616_v58 = vmul.f32 %v2615_v57, %v2615_v57 }
0x129e   : > { %v2617_v59 = vsel %vm2405_vm6, %v2616_v58, 0.0 }
0x129f   : > { %2618 = vadd.xlane.f32.xlu1 %v2617_v59 }
0x132c   : > { %v2619_v60 = vpop.xlane.xlu1 %2618 }
0x132d   : > { %v2620_v61 = vmul.f32 0.03125, %v2619_v60 }
0x132f   : > { %v2621_v62 = vadd.f32 1e-05, %v2620_v61 }
0x1331   : > { %3253 = vrsqrt.f32 %v2621_v62 }
0x133b   : > { %v3254_v63 = vpop.eup %3253 }
0x133c   : > { %v2623_v1 = vmul.f32 %v3254_v63, %v2615_v57 }
0x133e   : > { %v2631_v4 = vmul.f32 %v2810_v0, %v2623_v1 }
0x1340   : > { %v2639_v5 = vadd.f32 %v2811_v2, %v2631_v4 }
0x1342   : > { %2640 = vst.msk [vmem:[%s435_s30] sm:$0x3f] %vm2405_vm6, %v2639_v5 }
0x1343 PF: > { %s23_s25 = sadd.s32 1, %s3261_s25  }
0x1344   : > { %p20_p4 = scmp.ge.s32.totalorder %s23_s25, 4  }
0x1346   :  { %22 = sbr.rel (!%p20_p4) target bundleno = 1 (0x1), region = 127 }

</bundles_post_ra>
